<compile_context>
chip_gen: v6e
topology: v6e:2x2x1
jax: 0.10.0
libtpu: 0.0.40
codegen_flags: <defaults>
</compile_context>

<pallas_src>
import jax
import jax.numpy as jnp
import numpy as np
from jax.experimental import pallas as pl
from jax.experimental.pallas import tpu as pltpu

C0, C1, C2, C3, CH = 3, 10, 16, 32, 5   # channels per layer; CH = 1 + 4 head outputs
K, PK, PS = 3, 3, 2                      # conv kernel, pool kernel, pool stride


# ----------------------------- static shape math -----------------------------

def _pnet_dims(H, W):
    d = {}
    d["Hp"], d["Wp"] = H + 2, W + 2                       # conv1 zero padding = 1
    d["OH1"], d["OW1"] = H, W                             # conv1 3x3, pad 1
    d["OHp"] = (d["OH1"] - PK) // PS + 1                  # MaxPool2d(3, 2), floor
    d["OWp"] = (d["OW1"] - PK) // PS + 1
    d["OH2"], d["OW2"] = d["OHp"] - 2, d["OWp"] - 2       # conv2 3x3 valid
    d["OH3"], d["OW3"] = d["OH2"] - 2, d["OW2"] - 2       # conv3 3x3 valid
    assert d["OH3"] >= 1 and d["OW3"] >= 1, "input too small for PNet"
    return d


# ----------------------- one-time parameter preparation -----------------------

def _banded(w, n_in_blocks, n_out_blocks, in_block_fn):
    """PyTorch conv weight (Cout, Cin, k, k) -> (k, n_in_blocks*Cin,
    n_out_blocks*Cout) banded GEMM matrices for the lane-packed layout.
    Output column block o, tap kw reads input lane block in_block_fn(o, kw)."""
    w = np.asarray(w, dtype=np.float32)
    cout, cin, k, _ = w.shape
    wt = np.transpose(w, (2, 3, 1, 0))                    # (kh, kw, Cin, Cout)
    wb = np.zeros((k, n_in_blocks * cin, n_out_blocks * cout), np.float32)
    for kh in range(k):
        for o in range(n_out_blocks):
            for kw in range(k):
                ib = in_block_fn(o, kw)
                wb[kh, ib * cin:(ib + 1) * cin, o * cout:(o + 1) * cout] = wt[kh, kw]
    return wb


def _head_banded(w41, b41, w42, b42, ow3):
    """Merge + de-interleave the two 1x1 heads: classifier logits occupy
    output lanes [0, ow3), bbox offsets occupy [ow3, 5*ow3) (ow-major, ch-minor)."""
    w41 = np.asarray(w41, np.float32)                     # (1, 32, 1, 1)
    w42 = np.asarray(w42, np.float32)                     # (4, 32, 1, 1)
    b41 = np.asarray(b41, np.float32)
    b42 = np.asarray(b42, np.float32)
    wh = np.zeros((1, ow3 * C3, ow3 * CH), np.float32)
    bh = np.zeros((1, ow3 * CH), np.float32)
    for o in range(ow3):
        wh[0, o * C3:(o + 1) * C3, o] = w41[0, :, 0, 0]
        bh[0, o] = b41[0]
        for c in range(4):
            wh[0, o * C3:(o + 1) * C3, ow3 + o * 4 + c] = w42[c, :, 0, 0]
            bh[0, ow3 + o * 4 + c] = b42[c]
    return wh, bh


def _tiled_bias(b, ow):
    b = np.asarray(b, dtype=np.float32)
    return jnp.asarray(np.tile(b, ow).reshape(1, -1))


def prepare_params(params, H, W, compute_dtype=jnp.float32):
    """Precompute all weight re-layouts once (never in the per-forward hot path).
    Use compute_dtype=jnp.bfloat16 on v6e/v7x to feed the MXU bf16 operands."""
    d = _pnet_dims(H, W)
    Wp, OW1, OW2, OW3 = d["Wp"], d["OW1"], d["OW2"], d["OW3"]
    w1, b1 = params["conv1"]
    w2, b2 = params["conv2"]
    w3, b3 = params["conv3"]
    w41, b41 = params["conv4_1"]
    w42, b42 = params["conv4_2"]
    wh, bh = _head_banded(w41, b41, w42, b42, OW3)
    cd = compute_dtype
    return {
        # conv1: standard banded, reads input lane block (o + kw)
        "w1": jnp.asarray(_banded(w1, Wp, OW1, lambda o, kw: o + kw), cd),
        "b1": _tiled_bias(b1, OW1),
        # conv2: reads the UN-compacted stride-2 pooled map -> lane block 2*(o+kw)
        "w2": jnp.asarray(_banded(w2, OW1 - 2, OW2, lambda o, kw: 2 * o + 2 * kw), cd),
        "b2": _tiled_bias(b2, OW2),
        # conv3: standard banded
        "w3": jnp.asarray(_banded(w3, OW2, OW3, lambda o, kw: o + kw), cd),
        "b3": _tiled_bias(b3, OW3),
        # merged + de-interleaved heads
        "wh": jnp.asarray(wh, cd),
        "bh": jnp.asarray(bh, jnp.float32),
        # nn.PReLU() default: one scalar slope per layer
        "slopes": jnp.concatenate([params["prelu1"], params["prelu2"],
                                   params["prelu3"]]).reshape(1, 3).astype(jnp.float32),
    }


# ------------------------------ fused Pallas kernel ---------------------------

def make_pnet_forward(B, H, W, block_b=8):
    d = _pnet_dims(H, W)
    Hp, Wp = d["Hp"], d["Wp"]
    OW1, OW2, OW3, OH3 = d["OW1"], d["OW2"], d["OW3"], d["OH3"]
    f32 = jnp.float32

    Bblk = max(1, min(block_b, B))       # images per grid step (stacked along rows)
    nsteps = -(-B // Bblk)               # grid length (keep even for v7x's 2 TCs)
    Bp = nsteps * Bblk                   # padded batch

    R0 = Bblk * Hp                       # stacked input rows per grid step
    R1 = R0 - 2                          # conv1 output rows (full stacked slab)
    Rm = R0 - 4                          # row-maxed rows
    R2 = R0 - 8                          # conv2 rows (un-compacted, space-A coords)
    R3 = R0 - 12                         # conv3 / head rows
    L0 = Wp * C0
    L1 = OW1 * C1
    Lp = (OW1 - 2) * C1                  # lane-pooled (un-compacted stride-2) width
    L2 = OW2 * C2
    L3 = OW3 * C3
    LH = OW3 * CH

    def kernel(x_ref, w1_ref, b1_ref, w2_ref, b2_ref, w3_ref, b3_ref,
               wh_ref, bh_ref, sl_ref, out_ref):
        cdt = w1_ref.dtype
        x = x_ref[0].astype(cdt)                                   # (R0, L0)

        # ---- conv1 (3x3, input pre-padded): banded GEMM per kernel row over the
        # whole batch-stacked slab.  Rows crossing image boundaries produce junk
        # that is never read at the valid per-image offsets downstream.
        y1 = jnp.dot(x[0:R1], w1_ref[0], preferred_element_type=f32)
        for kh in range(1, K):
            y1 = y1 + jnp.dot(x[kh:kh + R1], w1_ref[kh], preferred_element_type=f32)
        y1 = y1 + b1_ref[...]                                      # (R1, L1)

        # ---- MaxPool2d(3, 2), entirely in vregs.  Row direction: 3 shifted
        # maxima.  Lane direction: 3 shifted maxima; the stride-2 selection is
        # left un-compacted (conv2's banded weight reads lane block 2*(ow+kw),
        # its row shifts use stride-2 offsets).
        rmax = jnp.maximum(jnp.maximum(y1[0:Rm], y1[1:Rm + 1]), y1[2:Rm + 2])
        pm = jnp.maximum(jnp.maximum(rmax[:, 0:Lp], rmax[:, C1:C1 + Lp]),
                         rmax[:, 2 * C1:2 * C1 + Lp])              # (Rm, Lp)

        # ---- PReLU 1 (after pooling, as in the PyTorch Sequential)
        s1 = sl_ref[0, 0]
        a1 = jnp.where(pm >= 0.0, pm, s1 * pm).astype(cdt)

        # ---- conv2 (3x3 valid on pooled map) + PReLU 2
        y2 = jnp.dot(a1[0:R2], w2_ref[0], preferred_element_type=f32)
        for kh in range(1, K):
            y2 = y2 + jnp.dot(a1[2 * kh:2 * kh + R2], w2_ref[kh],
                              preferred_element_type=f32)
        y2 = y2 + b2_ref[...]
        s2 = sl_ref[0, 1]
        a2 = jnp.where(y2 >= 0.0, y2, s2 * y2).astype(cdt)         # (R2, L2)

        # ---- conv3 (3x3 valid) + PReLU 3 (row stride 2 persists in pooled units)
        y3 = jnp.dot(a2[0:R3], w3_ref[0], preferred_element_type=f32)
        for kh in range(1, K):
            y3 = y3 + jnp.dot(a2[2 * kh:2 * kh + R3], w3_ref[kh],
                              preferred_element_type=f32)
        y3 = y3 + b3_ref[...]
        s3 = sl_ref[0, 2]
        a3 = jnp.where(y3 >= 0.0, y3, s3 * y3).astype(cdt)         # (R3, L3)

        # ---- merged + de-interleaved 1x1 heads: one GEMM, one vector-wide
        # sigmoid under a lane mask, one dense slab store.
        hv = jnp.dot(a3, wh_ref[0], preferred_element_type=f32) + bh_ref[...]
        lane = jax.lax.broadcasted_iota(jnp.int32, hv.shape, 1)
        sig = 1.0 / (1.0 + jnp.exp(-hv))
        out_ref[0] = jnp.where(lane < OW3, sig, hv)

    call = pl.pallas_call(
        kernel,
        out_shape=jax.ShapeDtypeStruct((nsteps, R3, LH), jnp.float32),
        grid=(nsteps,),
        in_specs=[
            pl.BlockSpec((1, R0, L0), lambda g: (g, 0, 0)),
            pl.BlockSpec((K, L0, L1), lambda g: (0, 0, 0)),
            pl.BlockSpec((1, L1), lambda g: (0, 0)),
            pl.BlockSpec((K, Lp, L2), lambda g: (0, 0, 0)),
            pl.BlockSpec((1, L2), lambda g: (0, 0)),
            pl.BlockSpec((K, L2, L3), lambda g: (0, 0, 0)),
            pl.BlockSpec((1, L3), lambda g: (0, 0)),
            pl.BlockSpec((1, L3, LH), lambda g: (0, 0, 0)),
            pl.BlockSpec((1, LH), lambda g: (0, 0)),
            pl.BlockSpec((1, 3), lambda g: (0, 0),
                         memory_space=pltpu.MemorySpace.SMEM),      # PReLU slopes
        ],
        out_specs=pl.BlockSpec((1, R3, LH), lambda g: (g, 0, 0)),
        compiler_params=pltpu.CompilerParams(dimension_semantics=("parallel",)),
    )

    # Valid head rows (per grid step): image j, output row oh3 -> row j*Hp + 2*oh3.
    row_idx = jnp.asarray(
        (np.arange(Bblk)[:, None] * Hp + 2 * np.arange(OH3)[None, :]).reshape(-1))

    def forward(prep, x_nchw):
        # Layout glue on the tiny raw input only: NCHW -> padded, lane-packed,
        # batch-stacked along rows.
        x = jnp.transpose(x_nchw, (0, 2, 3, 1)).astype(jnp.float32)
        if Bp != B:
            x = jnp.pad(x, ((0, Bp - B), (0, 0), (0, 0), (0, 0)))
        x = jnp.pad(x, ((0, 0), (1, 1), (1, 1), (0, 0)))
        x = x.reshape(Bp, Hp, Wp * C0).reshape(nsteps, R0, L0)

        out = call(x, prep["w1"], prep["b1"], prep["w2"], prep["b2"],
                   prep["w3"], prep["b3"], prep["wh"], prep["bh"], prep["slopes"])

        # Wrapper-side row selection + de-interleave split (layout plumbing only).
        sel = out[:, row_idx, :].reshape(Bp, OH3, LH)[:B]           # (B, OH3, OW3*5)
        cond = sel[..., :OW3][:, None, :, :]                        # (B, 1, OH3, OW3)
        offset = sel[..., OW3:].reshape(B, OH3, OW3, 4).transpose(0, 3, 1, 2)
        return cond, offset

    return forward


# ------------------------------ params / reference ----------------------------

def init_params(key):
    def conv_init(k, cout, cin, ksz):
        k1, k2 = jax.random.split(k)
        fan_in = cin * ksz * ksz
        w = jax.random.normal(k1, (cout, cin, ksz, ksz), jnp.float32) / jnp.sqrt(fan_in)
        b = jax.random.normal(k2, (cout,), jnp.float32) * 0.01
        return w, b

    ks = jax.random.split(key, 5)
    return {
        "conv1": conv_init(ks[0], C1, C0, 3),
        "conv2": conv_init(ks[1], C2, C1, 3),
        "conv3": conv_init(ks[2], C3, C2, 3),
        "conv4_1": conv_init(ks[3], 1, C3, 1),
        "conv4_2": conv_init(ks[4], 4, C3, 1),
        # nn.PReLU() default: one learnable slope per layer, init 0.25
        "prelu1": jnp.full((1,), 0.25, jnp.float32),
        "prelu2": jnp.full((1,), 0.25, jnp.float32),
        "prelu3": jnp.full((1,), 0.25, jnp.float32),
    }


def pnet_reference(params, x):
    """Pure-JAX reference matching the PyTorch module (for validation)."""
    dn = ("NCHW", "OIHW", "NCHW")

    def conv(x, wb, pad):
        w, b = wb
        y = jax.lax.conv_general_dilated(x, w, (1, 1), [(pad, pad), (pad, pad)],
                                         dimension_numbers=dn)
        return y + b.reshape(1, -1, 1, 1)

    def prelu(x, a):
        return jnp.where(x >= 0, x, a.reshape(1, 1, 1, 1) * x)

    y = conv(x, params["conv1"], 1)
    y = jax.lax.reduce_window(y, -jnp.inf, jax.lax.max,
                              (1, 1, PK, PK), (1, 1, PS, PS), "VALID")
    y = prelu(y, params["prelu1"])
    y = prelu(conv(y, params["conv2"], 0), params["prelu2"])
    y = prelu(conv(y, params["conv3"], 0), params["prelu3"])
    cond = jax.nn.sigmoid(conv(y, params["conv4_1"], 0))
    offset = conv(y, params["conv4_2"], 0)
    return cond, offset


# ------------------------------------ main ------------------------------------

if __name__ == "__main__":
    B, H, W = 16, 12, 12                 # canonical PNet receptive field, small batch
    key = jax.random.PRNGKey(0)
    pkey, xkey = jax.random.split(key)
    params = init_params(pkey)
    x = jax.random.normal(xkey, (B, C0, H, W), jnp.float32)

    # One-time weight re-layout (pass compute_dtype=jnp.bfloat16 on v6e/v7x).
    prep = prepare_params(params, H, W, compute_dtype=jnp.float32)
    # Bblk=8 -> conv GEMMs with M ~= 110 rows; grid of 2 steps (even, for v7x).
    forward = jax.jit(make_pnet_forward(B, H, W, block_b=8))

    cond, offset = forward(prep, x)
    jax.block_until_ready((cond, offset))

    d = _pnet_dims(H, W)
    assert cond.shape == (B, 1, d["OH3"], d["OW3"])
    assert offset.shape == (B, 4, d["OH3"], d["OW3"])
    assert bool(jnp.all((cond >= 0.0) & (cond <= 1.0)))

    ref_cond, ref_off = pnet_reference(params, x)
    err_c = float(jnp.max(jnp.abs(cond - ref_cond)))
    err_o = float(jnp.max(jnp.abs(offset - ref_off)))
    assert err_c < 5e-2 and err_o < 5e-2, ("mismatch vs reference", err_c, err_o)

    print("KERNEL_OK")
</pallas_src>

<mosaic_0001>
module attributes {stable_mosaic.version = 11 : i64} {
  func.func @kernel(%arg0: i32, %arg1: memref<1x112x42xf32, #tpu.memory_space<vmem>>, %arg2: memref<3x42x120xf32, #tpu.memory_space<vmem>>, %arg3: memref<1x120xf32, #tpu.memory_space<vmem>>, %arg4: memref<3x100x48xf32, #tpu.memory_space<vmem>>, %arg5: memref<1x48xf32, #tpu.memory_space<vmem>>, %arg6: memref<3x48x32xf32, #tpu.memory_space<vmem>>, %arg7: memref<1x32xf32, #tpu.memory_space<vmem>>, %arg8: memref<1x32x5xf32, #tpu.memory_space<vmem>>, %arg9: memref<1x5xf32, #tpu.memory_space<vmem>>, %arg10: memref<1x3xf32, #tpu.memory_space<smem>>, %arg11: memref<1x100x5xf32, #tpu.memory_space<vmem>>) attributes {dimension_semantics = [#tpu.dimension_semantics<parallel>], iteration_bounds = array<i64: 2>, scalar_prefetch = 0 : i64, scratch_operands = 0 : i64, tpu.core_type = #tpu.core_type<tc>, window_params = [{transform_indices = @transform_0, window_bounds = array<i64: 1, 112, 42>}, {pipeline_mode = #tpu.pipeline_mode<synchronous>, transform_indices = @transform_1, window_bounds = array<i64: 3, 42, 120>}, {pipeline_mode = #tpu.pipeline_mode<synchronous>, transform_indices = @transform_2, window_bounds = array<i64: 1, 120>}, {pipeline_mode = #tpu.pipeline_mode<synchronous>, transform_indices = @transform_3, window_bounds = array<i64: 3, 100, 48>}, {pipeline_mode = #tpu.pipeline_mode<synchronous>, transform_indices = @transform_4, window_bounds = array<i64: 1, 48>}, {pipeline_mode = #tpu.pipeline_mode<synchronous>, transform_indices = @transform_5, window_bounds = array<i64: 3, 48, 32>}, {pipeline_mode = #tpu.pipeline_mode<synchronous>, transform_indices = @transform_6, window_bounds = array<i64: 1, 32>}, {pipeline_mode = #tpu.pipeline_mode<synchronous>, transform_indices = @transform_7, window_bounds = array<i64: 1, 32, 5>}, {pipeline_mode = #tpu.pipeline_mode<synchronous>, transform_indices = @transform_8, window_bounds = array<i64: 1, 5>}, {transform_indices = @transform_9, window_bounds = array<i64: 1, 3>}, {transform_indices = @transform_10, window_bounds = array<i64: 1, 100, 5>}]} {
    %c0 = arith.constant 0 : index
    %c0_0 = arith.constant 0 : index
    %c0_1 = arith.constant 0 : index
    %0 = vector.load %arg1[%c0, %c0_0, %c0_1] : memref<1x112x42xf32, #tpu.memory_space<vmem>>, vector<1x112x42xf32>
    %1 = vector.shape_cast %0 : vector<1x112x42xf32> to vector<112x42xf32>
    %2 = vector.extract_strided_slice %1 {offsets = [0, 0], sizes = [110, 42], strides = [1, 1]} : vector<112x42xf32> to vector<110x42xf32>
    %c0_2 = arith.constant 0 : index
    %c0_3 = arith.constant 0 : index
    %c0_4 = arith.constant 0 : index
    %3 = vector.load %arg2[%c0_2, %c0_3, %c0_4] : memref<3x42x120xf32, #tpu.memory_space<vmem>>, vector<1x42x120xf32>
    %4 = vector.shape_cast %3 : vector<1x42x120xf32> to vector<42x120xf32>
    %cst = arith.constant dense<0.000000e+00> : vector<110x120xf32>
    %5 = tpu.matmul %2, %4, %cst {dimension_numbers = #tpu.dot_dimension_numbers<[1], [0], [0], [1], [0, 0, 1, 1], [], []>} : vector<110x42xf32>, vector<42x120xf32>, vector<110x120xf32> -> vector<110x120xf32>
    %6 = vector.extract_strided_slice %1 {offsets = [1, 0], sizes = [110, 42], strides = [1, 1]} : vector<112x42xf32> to vector<110x42xf32>
    %c1 = arith.constant 1 : index
    %c0_5 = arith.constant 0 : index
    %c0_6 = arith.constant 0 : index
    %7 = vector.load %arg2[%c1, %c0_5, %c0_6] : memref<3x42x120xf32, #tpu.memory_space<vmem>>, vector<1x42x120xf32>
    %8 = vector.shape_cast %7 : vector<1x42x120xf32> to vector<42x120xf32>
    %cst_7 = arith.constant dense<0.000000e+00> : vector<110x120xf32>
    %9 = tpu.matmul %6, %8, %cst_7 {dimension_numbers = #tpu.dot_dimension_numbers<[1], [0], [0], [1], [0, 0, 1, 1], [], []>} : vector<110x42xf32>, vector<42x120xf32>, vector<110x120xf32> -> vector<110x120xf32>
    %10 = arith.addf %5, %9 : vector<110x120xf32>
    %11 = vector.extract_strided_slice %1 {offsets = [2, 0], sizes = [110, 42], strides = [1, 1]} : vector<112x42xf32> to vector<110x42xf32>
    %c2 = arith.constant 2 : index
    %c0_8 = arith.constant 0 : index
    %c0_9 = arith.constant 0 : index
    %12 = vector.load %arg2[%c2, %c0_8, %c0_9] : memref<3x42x120xf32, #tpu.memory_space<vmem>>, vector<1x42x120xf32>
    %13 = vector.shape_cast %12 : vector<1x42x120xf32> to vector<42x120xf32>
    %cst_10 = arith.constant dense<0.000000e+00> : vector<110x120xf32>
    %14 = tpu.matmul %11, %13, %cst_10 {dimension_numbers = #tpu.dot_dimension_numbers<[1], [0], [0], [1], [0, 0, 1, 1], [], []>} : vector<110x42xf32>, vector<42x120xf32>, vector<110x120xf32> -> vector<110x120xf32>
    %15 = arith.addf %10, %14 : vector<110x120xf32>
    %c0_11 = arith.constant 0 : index
    %c0_12 = arith.constant 0 : index
    %16 = vector.load %arg3[%c0_11, %c0_12] : memref<1x120xf32, #tpu.memory_space<vmem>>, vector<1x120xf32>
    %17 = vector.broadcast %16 : vector<1x120xf32> to vector<110x120xf32>
    %18 = arith.addf %15, %17 : vector<110x120xf32>
    %19 = vector.extract_strided_slice %18 {offsets = [0, 0], sizes = [108, 120], strides = [1, 1]} : vector<110x120xf32> to vector<108x120xf32>
    %20 = vector.extract_strided_slice %18 {offsets = [1, 0], sizes = [108, 120], strides = [1, 1]} : vector<110x120xf32> to vector<108x120xf32>
    %21 = arith.maximumf %19, %20 : vector<108x120xf32>
    %22 = vector.extract_strided_slice %18 {offsets = [2, 0], sizes = [108, 120], strides = [1, 1]} : vector<110x120xf32> to vector<108x120xf32>
    %23 = arith.maximumf %21, %22 : vector<108x120xf32>
    %24 = vector.extract_strided_slice %23 {offsets = [0, 0], sizes = [108, 100], strides = [1, 1]} : vector<108x120xf32> to vector<108x100xf32>
    %25 = vector.extract_strided_slice %23 {offsets = [0, 10], sizes = [108, 100], strides = [1, 1]} : vector<108x120xf32> to vector<108x100xf32>
    %26 = arith.maximumf %24, %25 : vector<108x100xf32>
    %27 = vector.extract_strided_slice %23 {offsets = [0, 20], sizes = [108, 100], strides = [1, 1]} : vector<108x120xf32> to vector<108x100xf32>
    %28 = arith.maximumf %26, %27 : vector<108x100xf32>
    %c0_13 = arith.constant 0 : index
    %c0_14 = arith.constant 0 : index
    %29 = memref.load %arg10[%c0_13, %c0_14] : memref<1x3xf32, #tpu.memory_space<smem>>
    %cst_15 = arith.constant 0.000000e+00 : f32
    %30 = vector.broadcast %cst_15 : f32 to vector<108x100xf32>
    %31 = arith.cmpf oge, %28, %30 : vector<108x100xf32>
    %32 = vector.broadcast %29 : f32 to vector<108x100xf32>
    %33 = arith.mulf %32, %28 : vector<108x100xf32>
    %34 = arith.select %31, %28, %33 : vector<108x100xi1>, vector<108x100xf32>
    %35 = vector.extract_strided_slice %34 {offsets = [0, 0], sizes = [104, 100], strides = [1, 1]} : vector<108x100xf32> to vector<104x100xf32>
    %c0_16 = arith.constant 0 : index
    %c0_17 = arith.constant 0 : index
    %c0_18 = arith.constant 0 : index
    %36 = vector.load %arg4[%c0_16, %c0_17, %c0_18] : memref<3x100x48xf32, #tpu.memory_space<vmem>>, vector<1x100x48xf32>
    %37 = vector.shape_cast %36 : vector<1x100x48xf32> to vector<100x48xf32>
    %cst_19 = arith.constant dense<0.000000e+00> : vector<104x48xf32>
    %38 = tpu.matmul %35, %37, %cst_19 {dimension_numbers = #tpu.dot_dimension_numbers<[1], [0], [0], [1], [0, 0, 1, 1], [], []>} : vector<104x100xf32>, vector<100x48xf32>, vector<104x48xf32> -> vector<104x48xf32>
    %39 = vector.extract_strided_slice %34 {offsets = [2, 0], sizes = [104, 100], strides = [1, 1]} : vector<108x100xf32> to vector<104x100xf32>
    %c1_20 = arith.constant 1 : index
    %c0_21 = arith.constant 0 : index
    %c0_22 = arith.constant 0 : index
    %40 = vector.load %arg4[%c1_20, %c0_21, %c0_22] : memref<3x100x48xf32, #tpu.memory_space<vmem>>, vector<1x100x48xf32>
    %41 = vector.shape_cast %40 : vector<1x100x48xf32> to vector<100x48xf32>
    %cst_23 = arith.constant dense<0.000000e+00> : vector<104x48xf32>
    %42 = tpu.matmul %39, %41, %cst_23 {dimension_numbers = #tpu.dot_dimension_numbers<[1], [0], [0], [1], [0, 0, 1, 1], [], []>} : vector<104x100xf32>, vector<100x48xf32>, vector<104x48xf32> -> vector<104x48xf32>
    %43 = arith.addf %38, %42 : vector<104x48xf32>
    %44 = vector.extract_strided_slice %34 {offsets = [4, 0], sizes = [104, 100], strides = [1, 1]} : vector<108x100xf32> to vector<104x100xf32>
    %c2_24 = arith.constant 2 : index
    %c0_25 = arith.constant 0 : index
    %c0_26 = arith.constant 0 : index
    %45 = vector.load %arg4[%c2_24, %c0_25, %c0_26] : memref<3x100x48xf32, #tpu.memory_space<vmem>>, vector<1x100x48xf32>
    %46 = vector.shape_cast %45 : vector<1x100x48xf32> to vector<100x48xf32>
    %cst_27 = arith.constant dense<0.000000e+00> : vector<104x48xf32>
    %47 = tpu.matmul %44, %46, %cst_27 {dimension_numbers = #tpu.dot_dimension_numbers<[1], [0], [0], [1], [0, 0, 1, 1], [], []>} : vector<104x100xf32>, vector<100x48xf32>, vector<104x48xf32> -> vector<104x48xf32>
    %48 = arith.addf %43, %47 : vector<104x48xf32>
    %c0_28 = arith.constant 0 : index
    %c0_29 = arith.constant 0 : index
    %49 = vector.load %arg5[%c0_28, %c0_29] : memref<1x48xf32, #tpu.memory_space<vmem>>, vector<1x48xf32>
    %50 = vector.broadcast %49 : vector<1x48xf32> to vector<104x48xf32>
    %51 = arith.addf %48, %50 : vector<104x48xf32>
    %c0_30 = arith.constant 0 : index
    %c1_31 = arith.constant 1 : index
    %52 = memref.load %arg10[%c0_30, %c1_31] : memref<1x3xf32, #tpu.memory_space<smem>>
    %cst_32 = arith.constant 0.000000e+00 : f32
    %53 = vector.broadcast %cst_32 : f32 to vector<104x48xf32>
    %54 = arith.cmpf oge, %51, %53 : vector<104x48xf32>
    %55 = vector.broadcast %52 : f32 to vector<104x48xf32>
    %56 = arith.mulf %55, %51 : vector<104x48xf32>
    %57 = arith.select %54, %51, %56 : vector<104x48xi1>, vector<104x48xf32>
    %58 = vector.extract_strided_slice %57 {offsets = [0, 0], sizes = [100, 48], strides = [1, 1]} : vector<104x48xf32> to vector<100x48xf32>
    %c0_33 = arith.constant 0 : index
    %c0_34 = arith.constant 0 : index
    %c0_35 = arith.constant 0 : index
    %59 = vector.load %arg6[%c0_33, %c0_34, %c0_35] : memref<3x48x32xf32, #tpu.memory_space<vmem>>, vector<1x48x32xf32>
    %60 = vector.shape_cast %59 : vector<1x48x32xf32> to vector<48x32xf32>
    %cst_36 = arith.constant dense<0.000000e+00> : vector<100x32xf32>
    %61 = tpu.matmul %58, %60, %cst_36 {dimension_numbers = #tpu.dot_dimension_numbers<[1], [0], [0], [1], [0, 0, 1, 1], [], []>} : vector<100x48xf32>, vector<48x32xf32>, vector<100x32xf32> -> vector<100x32xf32>
    %62 = vector.extract_strided_slice %57 {offsets = [2, 0], sizes = [100, 48], strides = [1, 1]} : vector<104x48xf32> to vector<100x48xf32>
    %c1_37 = arith.constant 1 : index
    %c0_38 = arith.constant 0 : index
    %c0_39 = arith.constant 0 : index
    %63 = vector.load %arg6[%c1_37, %c0_38, %c0_39] : memref<3x48x32xf32, #tpu.memory_space<vmem>>, vector<1x48x32xf32>
    %64 = vector.shape_cast %63 : vector<1x48x32xf32> to vector<48x32xf32>
    %cst_40 = arith.constant dense<0.000000e+00> : vector<100x32xf32>
    %65 = tpu.matmul %62, %64, %cst_40 {dimension_numbers = #tpu.dot_dimension_numbers<[1], [0], [0], [1], [0, 0, 1, 1], [], []>} : vector<100x48xf32>, vector<48x32xf32>, vector<100x32xf32> -> vector<100x32xf32>
    %66 = arith.addf %61, %65 : vector<100x32xf32>
    %67 = vector.extract_strided_slice %57 {offsets = [4, 0], sizes = [100, 48], strides = [1, 1]} : vector<104x48xf32> to vector<100x48xf32>
    %c2_41 = arith.constant 2 : index
    %c0_42 = arith.constant 0 : index
    %c0_43 = arith.constant 0 : index
    %68 = vector.load %arg6[%c2_41, %c0_42, %c0_43] : memref<3x48x32xf32, #tpu.memory_space<vmem>>, vector<1x48x32xf32>
    %69 = vector.shape_cast %68 : vector<1x48x32xf32> to vector<48x32xf32>
    %cst_44 = arith.constant dense<0.000000e+00> : vector<100x32xf32>
    %70 = tpu.matmul %67, %69, %cst_44 {dimension_numbers = #tpu.dot_dimension_numbers<[1], [0], [0], [1], [0, 0, 1, 1], [], []>} : vector<100x48xf32>, vector<48x32xf32>, vector<100x32xf32> -> vector<100x32xf32>
    %71 = arith.addf %66, %70 : vector<100x32xf32>
    %c0_45 = arith.constant 0 : index
    %c0_46 = arith.constant 0 : index
    %72 = vector.load %arg7[%c0_45, %c0_46] : memref<1x32xf32, #tpu.memory_space<vmem>>, vector<1x32xf32>
    %73 = vector.broadcast %72 : vector<1x32xf32> to vector<100x32xf32>
    %74 = arith.addf %71, %73 : vector<100x32xf32>
    %c0_47 = arith.constant 0 : index
    %c2_48 = arith.constant 2 : index
    %75 = memref.load %arg10[%c0_47, %c2_48] : memref<1x3xf32, #tpu.memory_space<smem>>
    %cst_49 = arith.constant 0.000000e+00 : f32
    %76 = vector.broadcast %cst_49 : f32 to vector<100x32xf32>
    %77 = arith.cmpf oge, %74, %76 : vector<100x32xf32>
    %78 = vector.broadcast %75 : f32 to vector<100x32xf32>
    %79 = arith.mulf %78, %74 : vector<100x32xf32>
    %80 = arith.select %77, %74, %79 : vector<100x32xi1>, vector<100x32xf32>
    %c0_50 = arith.constant 0 : index
    %c0_51 = arith.constant 0 : index
    %c0_52 = arith.constant 0 : index
    %81 = vector.load %arg8[%c0_50, %c0_51, %c0_52] : memref<1x32x5xf32, #tpu.memory_space<vmem>>, vector<1x32x5xf32>
    %82 = vector.shape_cast %81 : vector<1x32x5xf32> to vector<32x5xf32>
    %cst_53 = arith.constant dense<0.000000e+00> : vector<100x5xf32>
    %83 = tpu.matmul %80, %82, %cst_53 {dimension_numbers = #tpu.dot_dimension_numbers<[1], [0], [0], [1], [0, 0, 1, 1], [], []>} : vector<100x32xf32>, vector<32x5xf32>, vector<100x5xf32> -> vector<100x5xf32>
    %c0_54 = arith.constant 0 : index
    %c0_55 = arith.constant 0 : index
    %84 = vector.load %arg9[%c0_54, %c0_55] : memref<1x5xf32, #tpu.memory_space<vmem>>, vector<1x5xf32>
    %85 = vector.broadcast %84 : vector<1x5xf32> to vector<100x5xf32>
    %86 = arith.addf %83, %85 : vector<100x5xf32>
    %87 = tpu.iota {dimensions = array<i32: 1>} : vector<100x5xi32>
    %cst_56 = arith.constant 0.000000e+00 : f32
    %88 = vector.broadcast %cst_56 : f32 to vector<100x5xf32>
    %89 = arith.subf %88, %86 : vector<100x5xf32>
    %90 = math.exp %89 : vector<100x5xf32>
    %cst_57 = arith.constant 1.000000e+00 : f32
    %91 = vector.broadcast %cst_57 : f32 to vector<100x5xf32>
    %92 = arith.addf %91, %90 : vector<100x5xf32>
    %cst_58 = arith.constant 1.000000e+00 : f32
    %93 = vector.broadcast %cst_58 : f32 to vector<100x5xf32>
    %94 = arith.divf %93, %92 : vector<100x5xf32>
    %c1_i32 = arith.constant 1 : i32
    %95 = vector.broadcast %c1_i32 : i32 to vector<100x5xi32>
    %96 = arith.cmpi slt, %87, %95 : vector<100x5xi32>
    %97 = arith.select %96, %94, %86 : vector<100x5xi1>, vector<100x5xf32>
    %c0_59 = arith.constant 0 : index
    %c0_60 = arith.constant 0 : index
    %c0_61 = arith.constant 0 : index
    %98 = vector.load %arg11[%c0_59, %c0_60, %c0_61] : memref<1x100x5xf32, #tpu.memory_space<vmem>>, vector<1x100x5xf32>
    %99 = vector.shape_cast %98 : vector<1x100x5xf32> to vector<100x5xf32>
    %100 = vector.shape_cast %97 : vector<100x5xf32> to vector<1x100x5xf32>
    tpu.vector_store %arg11[%c0_59, %c0_60, %c0_61], %100 {strides = array<i32>} : memref<1x100x5xf32, #tpu.memory_space<vmem>>, vector<1x100x5xf32>,
    return
  }
  func.func @transform_0(%arg0: i32) -> (i32, i32, i32) {
    %c0_i32 = arith.constant 0 : i32
    %c0_i32_0 = arith.constant 0 : i32
    %c0_i32_1 = arith.constant 0 : i32
    return %arg0, %c0_i32, %c0_i32_0 : i32, i32, i32
  }
  func.func @transform_1(%arg0: i32) -> (i32, i32, i32) {
    %c0_i32 = arith.constant 0 : i32
    %c0_i32_0 = arith.constant 0 : i32
    %c0_i32_1 = arith.constant 0 : i32
    %c0_i32_2 = arith.constant 0 : i32
    return %c0_i32, %c0_i32_0, %c0_i32_1 : i32, i32, i32
  }
  func.func @transform_2(%arg0: i32) -> (i32, i32) {
    %c0_i32 = arith.constant 0 : i32
    %c0_i32_0 = arith.constant 0 : i32
    %c0_i32_1 = arith.constant 0 : i32
    return %c0_i32, %c0_i32_0 : i32, i32
  }
  func.func @transform_3(%arg0: i32) -> (i32, i32, i32) {
    %c0_i32 = arith.constant 0 : i32
    %c0_i32_0 = arith.constant 0 : i32
    %c0_i32_1 = arith.constant 0 : i32
    %c0_i32_2 = arith.constant 0 : i32
    return %c0_i32, %c0_i32_0, %c0_i32_1 : i32, i32, i32
  }
  func.func @transform_4(%arg0: i32) -> (i32, i32) {
    %c0_i32 = arith.constant 0 : i32
    %c0_i32_0 = arith.constant 0 : i32
    %c0_i32_1 = arith.constant 0 : i32
    return %c0_i32, %c0_i32_0 : i32, i32
  }
  func.func @transform_5(%arg0: i32) -> (i32, i32, i32) {
    %c0_i32 = arith.constant 0 : i32
    %c0_i32_0 = arith.constant 0 : i32
    %c0_i32_1 = arith.constant 0 : i32
    %c0_i32_2 = arith.constant 0 : i32
    return %c0_i32, %c0_i32_0, %c0_i32_1 : i32, i32, i32
  }
  func.func @transform_6(%arg0: i32) -> (i32, i32) {
    %c0_i32 = arith.constant 0 : i32
    %c0_i32_0 = arith.constant 0 : i32
    %c0_i32_1 = arith.constant 0 : i32
    return %c0_i32, %c0_i32_0 : i32, i32
  }
  func.func @transform_7(%arg0: i32) -> (i32, i32, i32) {
    %c0_i32 = arith.constant 0 : i32
    %c0_i32_0 = arith.constant 0 : i32
    %c0_i32_1 = arith.constant 0 : i32
    %c0_i32_2 = arith.constant 0 : i32
    return %c0_i32, %c0_i32_0, %c0_i32_1 : i32, i32, i32
  }
  func.func @transform_8(%arg0: i32) -> (i32, i32) {
    %c0_i32 = arith.constant 0 : i32
    %c0_i32_0 = arith.constant 0 : i32
    %c0_i32_1 = arith.constant 0 : i32
    return %c0_i32, %c0_i32_0 : i32, i32
  }
  func.func @transform_9(%arg0: i32) -> (i32, i32) {
    %c0_i32 = arith.constant 0 : i32
    %c0_i32_0 = arith.constant 0 : i32
    %c0_i32_1 = arith.constant 0 : i32
    return %c0_i32, %c0_i32_0 : i32, i32
  }
  func.func @transform_10(%arg0: i32) -> (i32, i32, i32) {
    %c0_i32 = arith.constant 0 : i32
    %c0_i32_0 = arith.constant 0 : i32
    %c0_i32_1 = arith.constant 0 : i32
    return %arg0, %c0_i32, %c0_i32_0 : i32, i32, i32
  }
}

</mosaic_0001>

<bundles_post_ra>
// kernel: forward.1
= control target key start
LH: loop header
LB: loop body
LE: loop exit
PB: predicated region body
PF: predicated region fallthrough
CT: control target
= control target key end

     0   :  { %15 = vsyncpa [#allocation3], 0  ;;  %s4054_s13 = smov 0   ;;  %s5576_s0 = inlined_call_operand.vmem [shape: f32[2,112,42], index: 0, kind: input, shape index: {}]   ;;  %s5577_s1 = inlined_call_operand.vmem [shape: f32[3,42,120], index: 1, kind: input, shape index: {}]   ;;  %s5578_s2 = inlined_call_operand.vmem [shape: f32[1,120], index: 2, kind: input, shape index: {}]   ;;  %s5579_s3 = inlined_call_operand.vmem [shape: f32[3,100,48], index: 3, kind: input, shape index: {}]   ;;  %s5580_s4 = inlined_call_operand.vmem [shape: f32[1,48], index: 4, kind: input, shape index: {}]   ;;  %s5581_s5 = inlined_call_operand.vmem [shape: f32[3,48,32], index: 5, kind: input, shape index: {}]   ;;  %s5582_s6 = inlined_call_operand.vmem [shape: f32[1,32], index: 6, kind: input, shape index: {}]   ;;  %s5583_s7 = inlined_call_operand.vmem [shape: f32[1,32,5], index: 7, kind: input, shape index: {}]   ;;  %s5584_s8 = inlined_call_operand.vmem [shape: f32[1,5], index: 8, kind: input, shape index: {}]   ;;  %s5585_s9 = inlined_call_operand.vmem [shape: f32[1,3], index: 9, kind: input, shape index: {}]   ;;  %s5586_s10 = inlined_call_operand.vmem [shape: f32[2,100,5], index: 10, kind: output, shape index: {}]  }
   0x1 LB: > { %s4060_s14 = sadd.s32 4294967295, %s3992_s13   ;;  %p2954_p0 = scmp.ge.s32.totalorder %s3992_s13, 1  ;;  %s3992_s13 = sphi %s4054_s13, %s21_s13  }
   0x2   : > { %p267_p1 = scmp.lt.s32.totalorder %s3992_s13, 3  ;;  %s304_s17 = sshll.u32 %s5585_s9, 4  ;;  %s305_s17 = int_to_ptr.vmem [resolvable:$true] %s304_s17 }
   0x3   : > { %p3900_p3 = scmp.eq.s32.totalorder %s4060_s14, 0  ;;  %s3967_s19 = scalar_lea.vmem %s305_s17, 16 }
   0x4   : > { %p4067_p2 = pnand %p2954_p0, %p267_p1  ;;  %p3968_p6 = scmp.ne.s32.totalorder %s305_s17, %s3967_s19 }
   0x5   : > { %p3975_p10 = scmp.lt.s32.totalorder %s305_s17, %s305_s17  ;;  %p3976_p11 = scmp.lt.s32.totalorder %s3967_s19, %s3967_s19 }
   0x6   : > { %p3896_p4 = pneg %p4067_p2 }
   0x7   : > { %p3977_p12 = por %p3976_p11, %p3975_p10 }
   0x8   : > { %p3897_p5 = pnand %p3900_p3, %p3896_p4 }
   0xa   : > { %p3969_p7 = pneg %p3897_p5 }
   0xc   : > { %p3970_p8 = pnand %p3969_p7, %p3968_p6 }
   0xe   : > { %p3971_p9 = pneg %p3970_p8 }
  0x10   : > { %p3978_p13 = pnand %p3977_p12, %p3971_p9 }
  0x12   : > { %3981 = shalt.err (!%p3978_p13)
}
  0x13   : > { %s3994_s20 = smov [#allocation2]   ;;  %325 = sbr.rel (%p4067_p2) target bundleno = 1190 (0x4a6), region = 60 }
  0x14   : > { %3899 = dma.vmem_to_smem (!%p3897_p5), %s305_s17, 16, %s3994_s20, [#allocation3]  }
  0x18   : > { %3987 = dma.done.wait (%p3900_p3), [#allocation3], 16  }
  0x19   : > { %3989 = vsyncadd (%p3900_p3), [#allocation3], 4294967280 }
  0x1a   : > { %331 = sfence }
  0x1b   : > { %v2966_v0 = vld [vmem:[%s5577_s1 + $0x58] sm:$0x3]  ;;  %vm472_vm0 = vcmask 1041408   ;;  %v393_v1 = vld [vmem:[%s5577_s1 + $0x28] sm:$0x3]  ;;  %v2965_v2 = vld [vmem:[%s5577_s1 + $0x50] sm:$0xff] }
  0x1c   : > { %3370 = vmatprep.subr.msk.mxu0 %vm472_vm0, %v2966_v0  ;;  %3403 = vmatprep.subr.msk.mxu1 %vm472_vm0, %v393_v1  ;;  %v392_v3 = vld [vmem:[%s5577_s1 + $0x20] sm:$0xff]  ;;  %p364_p0 = scmp.lt.s32.totalorder %s4060_s14, 1  ;;  %v2964_v4 = vld [vmem:[%s5577_s1 + $0x48] sm:$0xff]  ;;  %v391_v5 = vld [vmem:[%s5577_s1 + $0x18] sm:$0xff]  ;;  %vm415_vm1 = vcmask 1046528   ;;  %vm443_vm2 = vcmask 343040  }
  0x1d   : > { %3371 = vmatpush3.msk.msra.mxu0 %vm472_vm0, %v2966_v0  ;;  %3404 = vmatpush3.msk.msra.mxu1 %vm472_vm0, %v393_v1  ;;  %v2963_v6 = vld [vmem:[%s5577_s1 + $0x40] sm:$0xff]  ;;  %v390_v7 = vld [vmem:[%s5577_s1 + $0x10] sm:$0xff]  ;;  %v2962_v8 = vld [vmem:[%s5577_s1 + $0x38] sm:$0xff]  ;;  %vm784_vm3 = vcmask 1045504   ;;  %vm1402_vm4 = vcmask 1043456   ;;  %s3996_s21 = smov 118  }
  0x1e   : > { %3372 = vmatprep.subr.mxu0 %v2965_v2  ;;  %3405 = vmatprep.subr.mxu1 %v392_v3  ;;  %s5589_s14 = smov (!%p364_p0, %s4060_s14), 1  ;;  %v389_v9 = vld [vmem:[%s5577_s1 + $0x8] sm:$0xff]  ;;  %v2961_v10 = vld [vmem:[%s5577_s1 + $0x30] sm:$0xff]  ;;  %v388_v11 = vld [vmem:[%s5577_s1] sm:$0xff]  ;;  %vm3997_vm5 = vmmov 0   ;;  %s3998_s24 = smov 108  }
  0x1f   : > { %3373 = vmatpush3.msra.mxu0 %v2965_v2  ;;  %3406 = vmatpush3.msra.mxu1 %v392_v3  ;;  %s3890_s19 = smul.u32 112, %s5589_s14  ;;  %v3002_v25 = vld [vmem:[%s5577_s1 + $0x88] sm:$0x3]  ;;  %v3001_v30 = vld [vmem:[%s5577_s1 + $0x80] sm:$0xff]  ;;  %v3000_v36 = vld [vmem:[%s5577_s1 + $0x78] sm:$0xff]  ;;  %s1263_s27 = sld [smem:[#allocation2]] }
  0x20   : > { %3374 = vmatprep.subr.mxu0 %v2964_v4  ;;  %3407 = vmatprep.subr.mxu1 %v391_v5  ;;  %v2999_v43 = vld [vmem:[%s5577_s1 + $0x70] sm:$0xff]  ;;  %v2998_v50 = vld [vmem:[%s5577_s1 + $0x68] sm:$0xff]  ;;  %v2997_v56 = vld [vmem:[%s5577_s1 + $0x60] sm:$0xff]  ;;  %vm1375_vm7 = vcmask 818176   ;;  %s3141_s29 = sld [smem:[#allocation2 + $0x2]]  ;;  %s3891_s16 = smul.u32 104, %s5589_s14 }
  0x21   : > { %3375 = vmatpush3.msra.mxu0 %v2964_v4  ;;  %3408 = vmatpush3.msra.mxu1 %v391_v5  ;;  %s4130_s30 = scalar_lea.vmem %s5576_s0, %s3890_s19 }
  0x22   : > { %3376 = vmatprep.subr.mxu0 %v2963_v6  ;;  %3409 = vmatprep.subr.mxu1 %v390_v7  ;;  %v4133_v12 = vld [vmem:[%s4130_s30] sm:$0xff]  ;;  %v4136_v13 = vld [vmem:[%s4130_s30 + $0x8] sm:$0xff]  ;;  %v4139_v14 = vld [vmem:[%s4130_s30 + $0x10] sm:$0xff]  ;;  %s5498_s19 = scalar_lea.vmem %s5586_s10, %s3891_s16 }
  0x23   : > { %3377 = vmatpush3.msra.mxu0 %v2963_v6  ;;  %3410 = vmatpush3.msra.mxu1 %v390_v7  ;;  %v416_v15 = vrot.slane %v4133_v12, 1  ;;  %v417_v16 = vrot.slane %v4136_v13, 1  ;;  %v419_v17 = vrot.slane %v4139_v14, 1  ;;  %v4145_v18 = vld [vmem:[%s4130_s30 + $0x18] sm:$0xff]  ;;  %v4148_v19 = vld [vmem:[%s4130_s30 + $0x20] sm:$0xff]  ;;  %v4152_v21 = vld [vmem:[%s4130_s30 + $0x28] sm:$0xff] }
  0x24   : > { %3378 = vmatprep.subr.mxu0 %v2962_v8  ;;  %3411 = vmatprep.subr.mxu1 %v389_v9  ;;  %v421_v20 = vrot.slane %v4145_v18, 1  ;;  %v423_v24 = vrot.slane %v4148_v19, 1  ;;  %v425_v27 = vrot.slane %v4152_v21, 1  ;;  %v4164_v28 = vld [vmem:[%s4130_s30 + $0x30] sm:$0xff]  ;;  %v4169_v29 = vld [vmem:[%s4130_s30 + $0x38] sm:$0xff]  ;;  %v4187_v35 = vld [vmem:[%s4130_s30 + $0x40] sm:$0xff] }
  0x25   : > { %3379 = vmatpush3.msra.mxu0 %v2962_v8  ;;  %3412 = vmatpush3.msra.mxu1 %v389_v9  ;;  %v418_v22 = vsel %vm415_vm1, %v416_v15, %v417_v16  ;;  %v420_v23 = vsel %vm415_vm1, %v417_v16, %v419_v17  ;;  %v427_v32 = vrot.slane %v4164_v28, 1  ;;  %v429_v34 = vrot.slane %v4169_v29, 1  ;;  %v4193_v37 = vld [vmem:[%s4130_s30 + $0x48] sm:$0xff]  ;;  %v4206_v42 = vld [vmem:[%s4130_s30 + $0x50] sm:$0xff]  ;;  %v4212_v44 = vld [vmem:[%s4130_s30 + $0x58] sm:$0xff] }
  0x26   : > { %3380 = vmatprep.subr.mxu0 %v2961_v10  ;;  %3413 = vmatprep.subr.mxu1 %v388_v11  ;;  %v422_v26 = vsel %vm415_vm1, %v419_v17, %v421_v20  ;;  %v424_v31 = vsel %vm415_vm1, %v421_v20, %v423_v24  ;;  %v426_v33 = vsel %vm415_vm1, %v423_v24, %v425_v27  ;;  %v431_v39 = vrot.slane %v4187_v35, 1  ;;  %v4225_v49 = vld [vmem:[%s4130_s30 + $0x60] sm:$0xff]  ;;  %v4231_v51 = vld [vmem:[%s4130_s30 + $0x68] sm:$0xff]  ;;  %v1318_v24 = vld [vmem:[%s5579_s3 + $0x58] sm:$0xff] }
  0x27   : > { %3381 = vmatpush3.msra.mxu0 %v2961_v10  ;;  %3382 = vmatprep.mubr.msk.f32.mxu0 %vm443_vm2, %v418_v22  ;;  %v428_v38 = vsel %vm415_vm1, %v425_v27, %v427_v32  ;;  %v430_v40 = vsel %vm415_vm1, %v427_v32, %v429_v34  ;;  %v433_v41 = vrot.slane %v4193_v37, 1  ;;  %v435_v46 = vrot.slane %v4206_v42, 1  ;;  %v1319_v22 = vld [vmem:[%s5579_s3 + $0x60] sm:$0xf]  ;;  %v1317_v27 = vld [vmem:[%s5579_s3 + $0x50] sm:$0xff]  ;;  %v3027_v32 = vld [vmem:[%s5579_s3 + $0xa8] sm:$0xff] }
  0x28   : > { %3414 = vmatpush3.msra.mxu1 %v388_v11  ;;  %3415 = vmatprep.mubr.msk.f32.mxu1 %vm443_vm2, %v4133_v12  ;;  %v432_v45 = vsel %vm415_vm1, %v429_v34, %v431_v39  ;;  %v437_v48 = vrot.slane %v4212_v44, 1  ;;  %v439_v53 = vrot.slane %v4225_v49, 1  ;;  %v441_v55 = vrot.slane %v4231_v51, 1  ;;  %v1313_v34 = vld [vmem:[%s5579_s3 + $0x30] sm:$0xff] }
  0x29   : > { %3383 = vmatmul.mubr.msk.f32.vlgmr.msra.gmra.mxu0 %vm443_vm2, %v420_v23  ;;  %3416 = vmatmul.mubr.msk.f32.vlgmr.msra.gmra.mxu1 %vm443_vm2, %v4136_v13  ;;  %v434_v47 = vsel %vm415_vm1, %v431_v39, %v433_v41  ;;  %v436_v52 = vsel %vm415_vm1, %v433_v41, %v435_v46  ;;  %v785_v59 = vrot.slane %v4133_v12, 2  ;;  %v786_v60 = vrot.slane %v4136_v13, 2 }
  0x2a   : > { %3436 = vmatprep.subr.msk.mxu0 %vm472_vm0, %v3002_v25  ;;  %3385 = vmatprep.mubr.msk.f32.mxu0 %vm443_vm2, %v422_v26  ;;  %v438_v54 = vsel %vm415_vm1, %v435_v46, %v437_v48  ;;  %v440_v57 = vsel %vm415_vm1, %v437_v48, %v439_v53  ;;  %v442_v58 = vsel %vm415_vm1, %v439_v53, %v441_v55  ;;  %v788_v61 = vrot.slane %v4139_v14, 2  ;;  %v3030_v26 = vld [vmem:[%s5579_s3 + $0xc0] sm:$0xff] }
  0x2b   : > { %3437 = vmatpush3.msk.msra.mxu0 %vm472_vm0, %v3002_v25  ;;  %3418 = vmatprep.mubr.msk.f32.mxu1 %vm443_vm2, %v4139_v14  ;;  %v787_v62 = vsel %vm784_vm3, %v785_v59, %v786_v60  ;;  %v790_v63 = vrot.slane %v4145_v18, 2  ;;  %v792_v1 = vrot.slane %v4148_v19, 2  ;;  %v794_v3 = vrot.slane %v4152_v21, 2  ;;  %v3031_v25 = vld [vmem:[%s5579_s3 + $0xc8] sm:$0xf] }
  0x2c   : > { %3438 = vmatprep.subr.mxu0 %v3001_v30  ;;  %v789_v0 = vsel %vm784_vm3, %v786_v60, %v788_v61  ;;  %v796_v5 = vrot.slane %v4164_v28, 2  ;;  %v798_v7 = vrot.slane %v4169_v29, 2  ;;  %v800_v9 = vrot.slane %v4187_v35, 2  ;;  %v4377_v60 = vld [vmem:[%s5578_s2] ss:$0 sm:$0xff] }
  0x2d   : > { %3386 = vmatmul.mubr.msk.f32.gmra.mxu0 %vm443_vm2, %v424_v31  ;;  %3419 = vmatmul.mubr.msk.f32.gmra.mxu1 %vm443_vm2, %v4145_v18  ;;  %v791_v2 = vsel %vm784_vm3, %v788_v61, %v790_v63  ;;  %v793_v4 = vsel %vm784_vm3, %v790_v63, %v792_v1  ;;  %v795_v6 = vsel %vm784_vm3, %v792_v1, %v794_v3  ;;  %v802_v11 = vrot.slane %v4193_v37, 2  ;;  %v1315_v31 = vld [vmem:[%s5579_s3 + $0x40] sm:$0xff] }
  0x2e   : > { %3439 = vmatpush3.msra.mxu0 %v3001_v30  ;;  %3388 = vmatprep.mubr.msk.f32.mxu0 %vm443_vm2, %v426_v33  ;;  %v797_v8 = vsel %vm784_vm3, %v794_v3, %v796_v5  ;;  %v799_v10 = vsel %vm784_vm3, %v796_v5, %v798_v7  ;;  %v801_v12 = vsel %vm784_vm3, %v798_v7, %v800_v9  ;;  %v804_v13 = vrot.slane %v4206_v42, 2  ;;  %v3028_v30 = vld [vmem:[%s5579_s3 + $0xb0] sm:$0xff]  ;;  %v1314_v33 = vld [vmem:[%s5579_s3 + $0x38] sm:$0xff]  ;;  %v3026_v1 = vld [vmem:[%s5579_s3 + $0xa0] sm:$0xff] }
  0x2f   : > { %3421 = vmatprep.mubr.msk.f32.mxu1 %vm443_vm2, %v4148_v19  ;;  %3440 = vmatprep.subr.mxu0 %v3000_v36  ;;  %v803_v14 = vsel %vm784_vm3, %v800_v9, %v802_v11  ;;  %v806_v15 = vrot.slane %v4212_v44, 2  ;;  %v808_v17 = vrot.slane %v4225_v49, 2  ;;  %v810_v19 = vrot.slane %v4231_v51, 2  ;;  %v3025_v5 = vld [vmem:[%s5579_s3 + $0x98] sm:$0xff] }
  0x30   : > { %3441 = vmatpush3.msra.mxu0 %v3000_v36  ;;  %v805_v16 = vsel %vm784_vm3, %v802_v11, %v804_v13  ;;  %v3995_v23 = vmov 0.0  }
  0x31   : > { %3389 = vmatmul.mubr.msk.f32.gmra.mxu0 %vm443_vm2, %v428_v38  ;;  %3422 = vmatmul.mubr.msk.f32.gmra.mxu1 %vm443_vm2, %v4152_v21  ;;  %v807_v18 = vsel %vm784_vm3, %v804_v13, %v806_v15  ;;  %v809_v20 = vsel %vm784_vm3, %v806_v15, %v808_v17  ;;  %v811_v21 = vsel %vm784_vm3, %v808_v17, %v810_v19 }
  0x32   : > { %3391 = vmatprep.mubr.msk.f32.mxu0 %vm443_vm2, %v430_v40  ;;  %3424 = vmatprep.mubr.msk.f32.mxu1 %vm443_vm2, %v4164_v28  ;;  %v3029_v28 = vld [vmem:[%s5579_s3 + $0xb8] sm:$0xff] }
  0x33   : > { %3442 = vmatprep.subr.mxu0 %v2999_v43  ;;  %3469 = vmatprep.subr.mxu1 %v3995_v23 }
  0x34   : > { %3443 = vmatpush3.msra.mxu0 %v2999_v43  ;;  %3470 = vmatpush3.msk.msra.mxu1 %vm1402_vm4, %v3031_v25 }
  0x35   : > { %3392 = vmatmul.mubr.msk.f32.gmra.mxu0 %vm443_vm2, %v432_v45  ;;  %3425 = vmatmul.mubr.msk.f32.gmra.mxu1 %vm443_vm2, %v4169_v29  ;;  %v1316_v29 = vld [vmem:[%s5579_s3 + $0x48] sm:$0xff] }
  0x36   : > { %3394 = vmatprep.mubr.msk.f32.mxu0 %vm443_vm2, %v434_v47  ;;  %3427 = vmatprep.mubr.msk.f32.mxu1 %vm443_vm2, %v4187_v35  ;;  %v1312_v35 = vld [vmem:[%s5579_s3 + $0x28] sm:$0xff] }
  0x37   : > { %3444 = vmatprep.subr.mxu0 %v2998_v50  ;;  %3471 = vmatprep.subr.mxu1 %v3995_v23 }
  0x38   : > { %3445 = vmatpush3.msra.mxu0 %v2998_v50  ;;  %3472 = vmatpush3.msra.mxu1 %v3030_v26 }
  0x39   : > { %3395 = vmatmul.mubr.msk.f32.gmra.mxu0 %vm443_vm2, %v436_v52  ;;  %3428 = vmatmul.mubr.msk.f32.gmra.mxu1 %vm443_vm2, %v4193_v37 }
  0x3a   : > { %3397 = vmatprep.mubr.msk.f32.mxu0 %vm443_vm2, %v438_v54  ;;  %3430 = vmatprep.mubr.msk.f32.mxu1 %vm443_vm2, %v4206_v42 }
  0x3b   : > { %3446 = vmatprep.subr.mxu0 %v2997_v56  ;;  %3473 = vmatprep.subr.mxu1 %v3995_v23 }
  0x3c   : > { %3447 = vmatpush3.msra.mxu0 %v2997_v56  ;;  %3474 = vmatpush3.msra.mxu1 %v3029_v28 }
  0x3d   : > { %3398 = vmatmul.mubr.msk.f32.gmra.mxu0 %vm443_vm2, %v440_v57  ;;  %3431 = vmatmul.mubr.msk.f32.gmra.mxu1 %vm443_vm2, %v4212_v44 }
  0x3e   : > { %3400 = vmatprep.mubr.msk.f32.mxu0 %vm443_vm2, %v442_v58  ;;  %3433 = vmatprep.mubr.msk.f32.mxu1 %vm443_vm2, %v4225_v49 }
  0x3f   : > { %3534 = vmatprep.subr.mxu0 %v3995_v23  ;;  %3475 = vmatprep.subr.mxu1 %v3995_v23 }
  0x40   : > { %3476 = vmatpush3.msra.mxu1 %v3028_v30 }
  0x41   : > { %3401 = vmatmul.mubr.msk.f32.gmra.mxu0 %vm443_vm2, %v441_v55  ;;  %3434 = vmatmul.mubr.msk.f32.gmra.mxu1 %vm443_vm2, %v4231_v51 }
  0x42   : > { %3448 = vmatprep.mubr.msk.f32.mxu0 %vm443_vm2, %v787_v62  ;;  %3477 = vmatprep.subr.mxu1 %v3995_v23 }
  0x43   : > { %3478 = vmatpush3.msra.mxu1 %v3027_v32  ;;  %3495 = vmatprep.mubr.msk.f32.mxu1 %vm3997_vm5, %v3995_v23 }
  0x44   : > { %3479 = vmatprep.subr.mxu1 %v3995_v23 }
  0x45   : > { %3449 = vmatmul.mubr.msk.f32.vlgmr.msra.gmra.mxu0 %vm443_vm2, %v789_v0  ;;  %v1311_v0 = vld [vmem:[%s5579_s3 + $0x20] sm:$0xff]  ;;  %3480 = vmatpush3.msra.mxu1 %v3026_v1 }
  0x46   : > { %3451 = vmatprep.mubr.msk.f32.mxu0 %vm443_vm2, %v791_v2  ;;  %3535 = vmatpush3.msk.msra.mxu0 %vm1402_vm4, %v1319_v22  ;;  %v1310_v2 = vld [vmem:[%s5579_s3 + $0x18] sm:$0xff] }
  0x47   : > { %3536 = vmatprep.subr.mxu0 %v3995_v23  ;;  %3481 = vmatprep.subr.mxu1 %v3995_v23 }
  0x48   : > { %3537 = vmatpush3.msra.mxu0 %v1318_v24  ;;  %3482 = vmatpush3.msra.mxu1 %v3025_v5  ;;  %v3024_v24 = vld [vmem:[%s5579_s3 + $0x90] sm:$0xff] }
  0x49   : > { %3452 = vmatmul.mubr.msk.f32.gmra.mxu0 %vm443_vm2, %v793_v4  ;;  %3538 = vmatprep.subr.mxu0 %v3995_v23 }
  0x4a   : > { %3454 = vmatprep.mubr.msk.f32.mxu0 %vm443_vm2, %v795_v6  ;;  %3539 = vmatpush3.msra.mxu0 %v1317_v27 }
  0x4b   : > { %3540 = vmatprep.subr.mxu0 %v3995_v23  ;;  %3483 = vmatprep.subr.mxu1 %v3995_v23 }
  0x4c   : > { %3541 = vmatpush3.msra.mxu0 %v1316_v29  ;;  %3484 = vmatpush3.msra.mxu1 %v3024_v24  ;;  %v1308_v29 = vld [vmem:[%s5579_s3 + $0x8] sm:$0xff] }
  0x4d   : > { %3455 = vmatmul.mubr.msk.f32.gmra.mxu0 %vm443_vm2, %v797_v8  ;;  %3542 = vmatprep.subr.mxu0 %v3995_v23 }
  0x4e   : > { %3457 = vmatprep.mubr.msk.f32.mxu0 %vm443_vm2, %v799_v10  ;;  %3543 = vmatpush3.msra.mxu0 %v1315_v31 }
  0x4f   : > { %3544 = vmatprep.subr.mxu0 %v3995_v23  ;;  %3485 = vmatprep.subr.mxu1 %v3995_v23 }
  0x50   : > { %3545 = vmatpush3.msra.mxu0 %v1314_v33 }
  0x51   : > { %3458 = vmatmul.mubr.msk.f32.gmra.mxu0 %vm443_vm2, %v801_v12  ;;  %3546 = vmatprep.subr.mxu0 %v3995_v23 }
  0x52   : > { %3460 = vmatprep.mubr.msk.f32.mxu0 %vm443_vm2, %v803_v14  ;;  %3547 = vmatpush3.msra.mxu0 %v1313_v34  ;;  %v3023_v34 = vld [vmem:[%s5579_s3 + $0x88] sm:$0xff] }
  0x53   : > { %3548 = vmatprep.subr.mxu0 %v3995_v23  ;;  %3486 = vmatpush3.msra.mxu1 %v3023_v34 }
  0x54   : > { %3549 = vmatpush3.msra.mxu0 %v1312_v35  ;;  %3487 = vmatprep.subr.mxu1 %v3995_v23 }
  0x55   : > { %3461 = vmatmul.mubr.msk.f32.gmra.mxu0 %vm443_vm2, %v805_v16  ;;  %3550 = vmatprep.subr.mxu0 %v3995_v23 }
  0x56   : > { %3463 = vmatprep.mubr.msk.f32.mxu0 %vm443_vm2, %v807_v18  ;;  %3551 = vmatpush3.msra.mxu0 %v1311_v0  ;;  %v3020_v0 = vld [vmem:[%s5579_s3 + $0x70] sm:$0xff] }
  0x57   : > { %3552 = vmatprep.subr.mxu0 %v3995_v23 }
  0x58   : > { %3553 = vmatpush3.msra.mxu0 %v1310_v2 }
  0x59   : > { %3464 = vmatmul.mubr.msk.f32.gmra.mxu0 %vm443_vm2, %v809_v20  ;;  %3554 = vmatprep.subr.mxu0 %v3995_v23  ;;  %v1309_v20 = vld [vmem:[%s5579_s3 + $0x10] sm:$0xff] }
  0x5a   : > { %3466 = vmatprep.mubr.msk.f32.mxu0 %vm443_vm2, %v811_v21  ;;  %3555 = vmatpush3.msra.mxu0 %v1309_v20 }
  0x5b   : > { %3556 = vmatprep.subr.mxu0 %v3995_v23 }
  0x5c   : > { %3557 = vmatpush3.msra.mxu0 %v1308_v29 }
  0x5d   : > { %3467 = vmatmul.mubr.msk.f32.gmra.mxu0 %vm443_vm2, %v810_v19  ;;  %3558 = vmatprep.subr.mxu0 %v3995_v23 }
  0x5e   : > { %3560 = vmatprep.mubr.msk.f32.mxu0 %vm3997_vm5, %v3995_v23 }
  0xe9   : > { %v3384_v36 = vpop.f32.mrf.mxu0  ;;  %v3417_v41 = vpop.f32.mrf.mxu1 }
  0xea   : > { %v714_v55 = vadd.f32 %v3417_v41, %v3384_v36  ;;  %v3022_v41 = vld [vmem:[%s5579_s3 + $0x80] sm:$0xff] }
  0xeb   : > { %v542_v37 = vpop.f32.mrf.mxu0  ;;  %v708_v44 = vpop.f32.mrf.mxu1  ;;  %3488 = vmatpush3.msra.mxu1 %v3022_v41 }
  0xec   : > { %v709_v57 = vadd.f32 %v708_v44, %v542_v37  ;;  %3489 = vmatprep.subr.mxu1 %v3995_v23 }
  0xed   : > { %v3387_v38 = vpop.f32.mrf.mxu0  ;;  %v3420_v47 = vpop.f32.mrf.mxu1 }
  0xee   : > { %v724_v62 = vadd.f32 %v3420_v47, %v3387_v38 }
  0xef   : > { %v552_v39 = vpop.f32.mrf.mxu0  ;;  %v718_v50 = vpop.f32.mrf.mxu1 }
  0xf0   : > { %v719_v6 = vadd.f32 %v718_v50, %v552_v39 }
  0xf1   : > { %v3390_v40 = vpop.f32.mrf.mxu0  ;;  %v3423_v53 = vpop.f32.mrf.mxu1 }
  0xf2   : > { %v734_v25 = vadd.f32 %v3423_v53, %v3390_v40  ;;  %v1307_v40 = vld [vmem:[%s5579_s3] sm:$0xff] }
  0xf3   : > { %v562_v42 = vpop.f32.mrf.mxu0  ;;  %v728_v58 = vpop.f32.mrf.mxu1  ;;  %3559 = vmatpush3.msra.mxu0 %v1307_v40 }
  0xf4   : > { %v729_v16 = vadd.f32 %v728_v58, %v562_v42  ;;  %3599 = vmatprep.subr.mxu0 %v3995_v23 }
  0xf5   : > { %v4360_v43 = vpop.f32.mrf.mxu0  ;;  %v4394_v7 = vpop.f32.mrf.mxu1 }
  0xf6   : > { %v744_v1 = vadd.f32 %v4394_v7, %v4360_v43 }
  0xf7   : > { %v572_v45 = vpop.f32.mrf.mxu0  ;;  %v738_v17 = vpop.f32.mrf.mxu1 }
  0xf8   : > { %v739_v30 = vadd.f32 %v738_v17, %v572_v45 }
  0xf9   : > { %v4362_v46 = vpop.f32.mrf.mxu0  ;;  %v4426_v35 = vpop.f32.mrf.mxu1 }
  0xfb   : > { %v4364_v48 = vpop.f32.mrf.mxu0  ;;  %v748_v58 = vpop.f32.mrf.mxu1 }
  0xfc   : > { %v749_v5 = vadd.f32 %v748_v58, %v4364_v48 }
  0xfd   : > { %v4366_v49 = vpop.f32.mrf.mxu0  ;;  %v3432_v7 = vpop.f32.mrf.mxu1 }
  0xff   : > { %v4368_v51 = vpop.f32.mrf.mxu0 }
 0x101   : > { %v4370_v52 = vpop.f32.mrf.mxu0 }
 0x103   : > { %v4372_v54 = vpop.f32.mrf.mxu0 }
 0x105   : > { %v3450_v56 = vpop.f32.mrf.mxu0 }
 0x106   : > { %v979_v59 = vadd.f32 %v3450_v56, %v714_v55  ;;  %v3021_v55 = vld [vmem:[%s5579_s3 + $0x78] sm:$0xff] }
 0x107   : > { %v909_v61 = vpop.f32.mrf.mxu0  ;;  %3490 = vmatpush3.msra.mxu1 %v3021_v55 }
 0x108   : > { %v978_v63 = vadd.f32 %v909_v61, %v709_v57  ;;  %v4389_v3 = vadd.f32 %v4377_v60, %v979_v59  ;;  %3491 = vmatprep.subr.mxu1 %v3995_v23 }
 0x109   : > { %v3453_v4 = vpop.f32.mrf.mxu0  ;;  %3492 = vmatpush3.msra.mxu1 %v3020_v0 }
 0x10a   : > { %v999_v8 = vadd.f32 %v4377_v60, %v978_v63  ;;  %v981_v9 = vadd.f32 %v3453_v4, %v724_v62  ;;  %v1028_v13 = vrot.slane %v4389_v3, 1  ;;  %v1083_v26 = vrot.slane %v4389_v3, 2  ;;  %3493 = vmatprep.subr.mxu1 %v3995_v23 }
 0x10b   : > { %v919_v10 = vpop.f32.mrf.mxu0 }
 0x10c   : > { %v1027_v11 = vrot.slane %v999_v8, 1  ;;  %v980_v12 = vadd.f32 %v919_v10, %v719_v6  ;;  %v4403_v14 = vadd.f32 %v4377_v60, %v981_v9  ;;  %v1082_v18 = vrot.slane %v999_v8, 2  ;;  %v3019_v6 = vld [vmem:[%s5579_s3 + $0x68] sm:$0xff] }
 0x10d   : > { %v3456_v15 = vpop.f32.mrf.mxu0  ;;  %3494 = vmatpush3.msra.mxu1 %v3019_v6 }
 0x10e   : > { %v4406_v19 = vadd.f32 %v4377_v60, %v980_v12  ;;  %v1029_v22 = vsel %vm415_vm1, %v1027_v11, %v1028_v13  ;;  %v1032_v31 = vrot.slane %v4403_v14, 1  ;;  %v983_v37 = vadd.f32 %v3456_v15, %v734_v25  ;;  %3864 = vmatprep.subr.mxu1 %v3995_v23 }
 0x10f   : > { %v929_v21 = vpop.f32.mrf.mxu0  ;;  %v1068_v33 = vmax.f32 %v999_v8, %v1029_v22  ;;  %v1084_v39 = vsel %vm784_vm3, %v1082_v18, %v1083_v26  ;;  %v1087_v2 = vrot.slane %v4403_v14, 2  ;;  %v758_v18 = vpop.f32.mrf.mxu1  ;;  %v754_v22 = vadd.f32 %v4426_v35, %v4362_v46 }
 0x110   : > { %v1030_v27 = vrot.slane %v4406_v19, 1  ;;  %v982_v28 = vadd.f32 %v929_v21, %v729_v16  ;;  %v1085_v36 = vrot.slane %v4406_v19, 2  ;;  %v4454_v59 = vadd.f32 %v4377_v60, %v983_v37 }
 0x111   : > { %v3459_v32 = vpop.f32.mrf.mxu0  ;;  %v4440_v42 = vmax.f32 %v1068_v33, %v1084_v39  ;;  %v3435_v29 = vpop.f32.mrf.mxu1 }
 0x112   : > { %v4430_v38 = vadd.f32 %v4377_v60, %v982_v28  ;;  %v1031_v45 = vsel %vm415_vm1, %v1028_v13, %v1030_v27  ;;  %v1033_v53 = vsel %vm415_vm1, %v1030_v27, %v1032_v31  ;;  %v1086_v61 = vsel %vm784_vm3, %v1083_v26, %v1085_v36 }
 0x113   : > { %v939_v44 = vpop.f32.mrf.mxu0  ;;  %1151 = vrot.lane.b32.xlu0 %v4440_v42, %s3996_s21  ;;  %v1069_v57 = vmax.f32 %v4389_v3, %v1031_v45  ;;  %v1070_v63 = vmax.f32 %v4406_v19, %v1033_v53  ;;  %v1036_v8 = vrot.slane %v4454_v59, 1  ;;  %v985_v10 = vadd.f32 %v3459_v32, %v744_v1 }
 0x114   : > { %v1034_v47 = vrot.slane %v4430_v38, 1  ;;  %v984_v50 = vadd.f32 %v939_v44, %v739_v30  ;;  %v1089_v9 = vrot.slane %v4430_v38, 2  ;;  %v1088_v48 = vsel %vm784_vm3, %v1085_v36, %v1087_v2 }
 0x115   : > { %v3462_v56 = vpop.f32.mrf.mxu0  ;;  %v4460_v62 = vmax.f32 %v1069_v57, %v1086_v61  ;;  %v4487_v11 = vmax.f32 %v1070_v63, %v1088_v48  ;;  %v1006_v19 = vadd.f32 %v4377_v60, %v985_v10  ;;  %v1091_v24 = vrot.slane %v4454_v59, 2 }
 0x116   : > { %v4470_v3 = vadd.f32 %v4377_v60, %v984_v50  ;;  %v1035_v4 = vsel %vm415_vm1, %v1032_v31, %v1034_v47  ;;  %v1037_v16 = vsel %vm415_vm1, %v1034_v47, %v1036_v8  ;;  %v759_v27 = vadd.f32 %v758_v18, %v4368_v51 }
 0x117   : > { %1207 = vrot.lane.b32.xlu0 %v4440_v42, %s3998_s24  ;;  %1153 = vrot.lane.b32.xlu1 %v4460_v62, %s3996_s21  ;;  %v949_v43 = vpop.f32.mrf.mxu0  ;;  %v1071_v12 = vmax.f32 %v4403_v14, %v1035_v4  ;;  %v1090_v14 = vsel %vm784_vm3, %v1087_v2, %v1089_v9  ;;  %v1072_v21 = vmax.f32 %v4430_v38, %v1037_v16  ;;  %v1040_v30 = vrot.slane %v1006_v19, 1  ;;  %v768_v38 = vpop.f32.mrf.mxu1 }
 0x118   : > { %v1038_v13 = vrot.slane %v4470_v3, 1  ;;  %v986_v15 = vadd.f32 %v949_v43, %v749_v5  ;;  %v1093_v31 = vrot.slane %v4470_v3, 2  ;;  %v987_v46 = vadd.f32 %v3462_v56, %v754_v22 }
 0x119   : > { %v3465_v17 = vpop.f32.mrf.mxu0  ;;  %v4500_v20 = vmax.f32 %v1071_v12, %v1090_v14  ;;  %v1092_v32 = vsel %vm784_vm3, %v1089_v9, %v1091_v24  ;;  %v764_v45 = vadd.f32 %v3432_v7, %v4366_v49  ;;  %v1095_v47 = vrot.slane %v1006_v19, 2 }
 0x11a   : > { %v1007_v25 = vadd.f32 %v4377_v60, %v986_v15  ;;  %v1039_v26 = vsel %vm415_vm1, %v1036_v8, %v1038_v13  ;;  %v4515_v33 = vmax.f32 %v1072_v21, %v1092_v32  ;;  %v1041_v36 = vsel %vm415_vm1, %v1038_v13, %v1040_v30 }
 0x11b   : > { %1155 = vrot.lane.b32.xlu0 %v4487_v11, %s3996_s21  ;;  %1209 = vrot.lane.b32.xlu1 %v4460_v62, %s3998_s24  ;;  %v959_v28 = vpop.f32.mrf.mxu0  ;;  %v1073_v34 = vmax.f32 %v4454_v59, %v1039_v26  ;;  %v1008_v39 = vadd.f32 %v4377_v60, %v987_v46  ;;  %v1094_v40 = vsel %vm784_vm3, %v1091_v24, %v1093_v31 }
 0x11c   : > { %v1042_v35 = vrot.slane %v1007_v25, 1  ;;  %v988_v51 = vadd.f32 %v959_v28, %v759_v27  ;;  %v1074_v44 = vmax.f32 %v4470_v3, %v1041_v36  ;;  %v769_v55 = vadd.f32 %v768_v38, %v4372_v54 }
 0x11d   : > { %v3468_v37 = vpop.f32.mrf.mxu0  ;;  %v4525_v41 = vmax.f32 %v1073_v34, %v1094_v40  ;;  %v1044_v57 = vrot.slane %v1008_v39, 1  ;;  %v1097_v58 = vrot.slane %v1007_v25, 2  ;;  %v989_v59 = vadd.f32 %v3465_v17, %v764_v45 }
 0x11e   : > { %v1009_v50 = vadd.f32 %v4377_v60, %v988_v51  ;;  %v1043_v53 = vsel %vm415_vm1, %v1040_v30, %v1042_v35  ;;  %v1096_v61 = vsel %vm784_vm3, %v1093_v31, %v1095_v47  ;;  %v774_v43 = vadd.f32 %v3435_v29, %v4370_v52 }
 0x11f   : > { %1211 = vrot.lane.b32.xlu1 %v4487_v11, %s3998_s24  ;;  %1157 = vrot.lane.b32.xlu0 %v4500_v20, %s3996_s21  ;;  %v969_v56 = vpop.f32.mrf.mxu0  ;;  %v4537_v49 = vmax.f32 %v1074_v44, %v1096_v61  ;;  %v1075_v63 = vmax.f32 %v1006_v19, %v1043_v53  ;;  %v1045_v2 = vsel %vm415_vm1, %v1042_v35, %v1044_v57  ;;  %v1099_v6 = vrot.slane %v1008_v39, 2 }
 0x120   : > { %v1046_v0 = vrot.slane %v1009_v50, 1  ;;  %v990_v1 = vadd.f32 %v969_v56, %v769_v55  ;;  %v1010_v54 = vadd.f32 %v4377_v60, %v989_v59  ;;  %v1098_v3 = vsel %vm784_vm3, %v1095_v47, %v1097_v58  ;;  %v3072_v55 = vld [vmem:[%s5579_s3 + $0x130] sm:$0xf] }
 0x121   : > { %v4546_v4 = vmax.f32 %v1075_v63, %v1098_v3  ;;  %v1076_v5 = vmax.f32 %v1007_v25, %v1045_v2  ;;  %v1101_v10 = vrot.slane %v1009_v50, 2  ;;  %v991_v48 = vadd.f32 %v3468_v37, %v774_v43  ;;  %v4626_v63 = vld [vmem:[%s5579_s3 + $0x120] sm:$0xff] }
 0x122   : > { %v1011_v7 = vadd.f32 %v4377_v60, %v990_v1  ;;  %v1047_v8 = vsel %vm415_vm1, %v1044_v57, %v1046_v0  ;;  %v1048_v9 = vrot.slane %v1010_v54, 1  ;;  %v1100_v12 = vsel %vm784_vm3, %v1097_v58, %v1099_v6  ;;  %v3071_v57 = vld [vmem:[%s5579_s3 + $0x128] sm:$0xff] }
 0x123   : > { %1213 = vrot.lane.b32.xlu1 %v4500_v20, %s3998_s24  ;;  %1159 = vrot.lane.b32.xlu0 %v4515_v33, %s3996_s21  ;;  %v4556_v13 = vmax.f32 %v1076_v5, %v1100_v12  ;;  %v1077_v15 = vmax.f32 %v1008_v39, %v1047_v8  ;;  %v1012_v17 = vadd.f32 %v4377_v60, %v991_v48  ;;  %v1103_v21 = vrot.slane %v1010_v54, 2 }
 0x124   : > { %v1050_v52 = vrot.slane %v1011_v7, 1  ;;  %v1049_v16 = vsel %vm415_vm1, %v1046_v0, %v1048_v9  ;;  %v1102_v18 = vsel %vm784_vm3, %v1099_v6, %v1101_v10  ;;  %v1105_v25 = vrot.slane %v1011_v7, 2 }
 0x125   : > { %v4565_v19 = vmax.f32 %v1077_v15, %v1102_v18  ;;  %v1078_v14 = vmax.f32 %v1009_v50, %v1049_v16  ;;  %v1052_v24 = vrot.slane %v1012_v17, 1  ;;  %v1104_v26 = vsel %vm784_vm3, %v1101_v10, %v1103_v21  ;;  %v4659_v10 = vld [vmem:[%s5579_s3 + $0x110] sm:$0xff] }
 0x126   : > { %v1051_v22 = vsel %vm415_vm1, %v1048_v9, %v1050_v52  ;;  %v1106_v29 = vsel %vm784_vm3, %v1103_v21, %v1105_v25  ;;  %v1107_v46 = vrot.slane %v1012_v17, 2  ;;  %v4603_v38 = vstv %s1263_s27 }
 0x127   : > { %1215 = vrot.lane.b32.xlu1 %v4515_v33, %s3998_s24  ;;  %1161 = vrot.lane.b32.xlu0 %v4525_v41, %s3996_s21  ;;  %v4573_v27 = vmax.f32 %v1078_v14, %v1104_v26  ;;  %v1079_v60 = vmax.f32 %v1010_v54, %v1051_v22  ;;  %v1053_v28 = vsel %vm415_vm1, %v1050_v52, %v1052_v24  ;;  %v4638_v54 = vld [vmem:[%s5579_s3 + $0x118] sm:$0xff]  ;;  %v4681_v14 = vld [vmem:[%s5579_s3 + $0x108] sm:$0xff] }
 0x128   : > { %v1080_v31 = vmax.f32 %v1011_v7, %v1053_v28  ;;  %v1108_v32 = vsel %vm784_vm3, %v1105_v25, %v1107_v46  ;;  %v1081_v35 = vmax.f32 %v1012_v17, %v1052_v24 }
 0x129   : > { %v4581_v30 = vmax.f32 %v1079_v60, %v1106_v29  ;;  %v4702_v29 = vld [vmem:[%s5579_s3 + $0x100] sm:$0xff] }
 0x12a   : > { %v4588_v34 = vmax.f32 %v1080_v31, %v1108_v32  ;;  %v4594_v51 = vmax.f32 %v1081_v35, %v1107_v46 }
 0x12b   : > { %1217 = vrot.lane.b32.xlu1 %v4525_v41, %s3998_s24  ;;  %1163 = vrot.lane.b32.xlu0 %v4537_v49, %s3996_s21 }
 0x12f   : > { %1219 = vrot.lane.b32.xlu1 %v4537_v49, %s3998_s24  ;;  %1165 = vrot.lane.b32.xlu0 %v4546_v4, %s3996_s21 }
 0x133   : > { %1221 = vrot.lane.b32.xlu1 %v4546_v4, %s3998_s24  ;;  %1167 = vrot.lane.b32.xlu0 %v4556_v13, %s3996_s21 }
 0x137   : > { %1223 = vrot.lane.b32.xlu1 %v4556_v13, %s3998_s24  ;;  %1169 = vrot.lane.b32.xlu0 %v4565_v19, %s3996_s21 }
 0x13b   : > { %1225 = vrot.lane.b32.xlu1 %v4565_v19, %s3998_s24  ;;  %1171 = vrot.lane.b32.xlu0 %v4573_v27, %s3996_s21 }
 0x13f   : > { %1227 = vrot.lane.b32.xlu1 %v4573_v27, %s3998_s24  ;;  %1173 = vrot.lane.b32.xlu0 %v4581_v30, %s3996_s21 }
 0x143   : > { %1229 = vrot.lane.b32.xlu1 %v4581_v30, %s3998_s24  ;;  %1175 = vrot.lane.b32.xlu0 %v4588_v34, %s3996_s21 }
 0x147   : > { %1231 = vrot.lane.b32.xlu1 %v4588_v34, %s3998_s24  ;;  %1177 = vrot.lane.b32.xlu0 %v4594_v51, %s3996_s21 }
 0x14b   : > { %1233 = vrot.lane.b32.xlu1 %v4594_v51, %s3998_s24  ;;  %s3088_s24 = sld [smem:[#allocation2 + $0x1]] }
 0x185   : > { %v1152_v36 = vpop.permute.xlu0 %1151 }
 0x186   : > { %v1193_v37 = vmax.f32 %v4440_v42, %v1152_v36 }
 0x189   : > { %v1208_v39 = vpop.permute.xlu0 %1207  ;;  %v1154_v40 = vpop.permute.xlu1 %1153 }
 0x18a   : > { %v1249_v44 = vmax.f32 %v1193_v37, %v1208_v39  ;;  %v1194_v47 = vmax.f32 %v4460_v62, %v1154_v40  ;;  %v4724_v40 = vld [vmem:[%s5579_s3 + $0xf8] sm:$0xff] }
 0x18c   : > { %vm1264_vm6 = vcmp.ge.f32.partialorder %v1249_v44, 0.0  ;;  %v1279_v45 = vmul.f32 %v4603_v38, %v1249_v44 }
 0x18d   : > { %v1156_v50 = vpop.permute.xlu0 %1155  ;;  %v1210_v53 = vpop.permute.xlu1 %1209 }
 0x18e   : > { %v4610_v56 = vsel %vm1264_vm6, %v1249_v44, %v1279_v45  ;;  %v1250_v42 = vmax.f32 %v1194_v47, %v1210_v53  ;;  %v1195_v58 = vmax.f32 %v4487_v11, %v1156_v50 }
 0x18f   : > { %3561 = vmatmul.mubr.msk.f32.vlgmr.msra.gmra.mxu0 %vm1375_vm7, %v4610_v56  ;;  %v1348_v11 = vrot.slane %v4610_v56, 2 }
 0x190   : > { %vm1265_vm8 = vcmp.ge.f32.partialorder %v1250_v42, 0.0  ;;  %v1280_v62 = vmul.f32 %v4603_v38, %v1250_v42  ;;  %3600 = vmatpush3.msk.msra.mxu0 %vm1402_vm4, %v3072_v55  ;;  %3563 = vmatprep.mubr.msk.f32.mxu0 %vm3997_vm5, %v3995_v23 }
 0x191   : > { %v1212_v59 = vpop.permute.xlu1 %1211  ;;  %v1158_v61 = vpop.permute.xlu0 %1157  ;;  %3601 = vmatprep.subr.mxu0 %v3995_v23 }
 0x192   : > { %v1251_v0 = vmax.f32 %v1195_v58, %v1212_v59  ;;  %v4628_v1 = vsel %vm1265_vm8, %v1250_v42, %v1280_v62  ;;  %3602 = vmatpush3.msra.mxu0 %v3071_v57  ;;  %v1196_v5 = vmax.f32 %v4500_v20, %v1158_v61 }
 0x193   : > { %v1349_v2 = vrot.slane %v4628_v1, 2  ;;  %3564 = vmatmul.mubr.msk.f32.gmra.mxu0 %vm1375_vm7, %v4628_v1  ;;  %3603 = vmatprep.subr.mxu0 %v3995_v23 }
 0x194   : > { %vm1266_vm9 = vcmp.ge.f32.partialorder %v1251_v0, 0.0  ;;  %v1281_v3 = vmul.f32 %v4603_v38, %v1251_v0  ;;  %3566 = vmatprep.mubr.msk.f32.mxu0 %vm3997_vm5, %v3995_v23  ;;  %3604 = vmatpush3.msra.mxu0 %v4626_v63 }
 0x195   : > { %v1214_v43 = vpop.permute.xlu1 %1213  ;;  %v1160_v6 = vpop.permute.xlu0 %1159  ;;  %v1350_v7 = vsel %vm784_vm3, %v1348_v11, %v1349_v2  ;;  %3605 = vmatprep.subr.mxu0 %v3995_v23 }
 0x196   : > { %v1252_v8 = vmax.f32 %v1196_v5, %v1214_v43  ;;  %3496 = vmatmul.mubr.msk.f32.vlgmr.msra.gmra.mxu1 %vm1375_vm7, %v1350_v7  ;;  %v4648_v9 = vsel %vm1266_vm9, %v1251_v0, %v1281_v3  ;;  %3606 = vmatpush3.msra.mxu0 %v4638_v54  ;;  %v1197_v12 = vmax.f32 %v4515_v33, %v1160_v6  ;;  %vm2020_vm9 = vcmask 392192  }
 0x197   : > { %v1351_v20 = vrot.slane %v4648_v9, 2  ;;  %3567 = vmatmul.mubr.msk.f32.gmra.mxu0 %vm1375_vm7, %v4648_v9  ;;  %3498 = vmatprep.mubr.msk.f32.mxu1 %vm3997_vm5, %v3995_v23 }
 0x198   : > { %vm1267_vm10 = vcmp.ge.f32.partialorder %v1252_v8, 0.0  ;;  %v1282_v48 = vmul.f32 %v4603_v38, %v1252_v8  ;;  %3569 = vmatprep.mubr.msk.f32.mxu0 %vm3997_vm5, %v3995_v23  ;;  %3877 = vmatpush3.msk.msra.mxu1 %vm1402_vm4, %v3072_v55 }
 0x199   : > { %v1216_v15 = vpop.permute.xlu1 %1215  ;;  %v1162_v52 = vpop.permute.xlu0 %1161  ;;  %v1352_v16 = vsel %vm784_vm3, %v1349_v2, %v1351_v20  ;;  %3865 = vmatprep.subr.mxu1 %v3995_v23  ;;  %3607 = vmatprep.subr.mxu0 %v3995_v23  ;;  %v4768_v2 = vld [vmem:[%s5579_s3 + $0xe8] sm:$0xff] }
 0x19a   : > { %v1253_v17 = vmax.f32 %v1197_v12, %v1216_v15  ;;  %3499 = vmatmul.mubr.msk.f32.gmra.mxu1 %vm1375_vm7, %v1352_v16  ;;  %v4670_v18 = vsel %vm1267_vm10, %v1252_v8, %v1282_v48  ;;  %3608 = vmatpush3.msra.mxu0 %v4659_v10  ;;  %v1198_v22 = vmax.f32 %v4525_v41, %v1162_v52 }
 0x19b   : > { %v1353_v33 = vrot.slane %v4670_v18, 2  ;;  %3570 = vmatmul.mubr.msk.f32.gmra.mxu0 %vm1375_vm7, %v4670_v18  ;;  %3501 = vmatprep.mubr.msk.f32.mxu1 %vm3997_vm5, %v3995_v23 }
 0x19c   : > { %vm1268_vm11 = vcmp.ge.f32.partialorder %v1253_v17, 0.0  ;;  %v1283_v21 = vmul.f32 %v4603_v38, %v1253_v17  ;;  %3572 = vmatprep.mubr.msk.f32.mxu0 %vm3997_vm5, %v3995_v23  ;;  %3878 = vmatpush3.msra.mxu1 %v3071_v57  ;;  %v4746_v57 = vld [vmem:[%s5579_s3 + $0xf0] sm:$0xff] }
 0x19d   : > { %v1218_v24 = vpop.permute.xlu1 %1217  ;;  %v1164_v25 = vpop.permute.xlu0 %1163  ;;  %v1354_v26 = vsel %vm784_vm3, %v1351_v20, %v1353_v33  ;;  %3866 = vmatprep.subr.mxu1 %v3995_v23  ;;  %3609 = vmatprep.subr.mxu0 %v3995_v23  ;;  %v4790_v20 = vld [vmem:[%s5579_s3 + $0xe0] sm:$0xff] }
 0x19e   : > { %v1254_v60 = vmax.f32 %v1198_v22, %v1218_v24  ;;  %3502 = vmatmul.mubr.msk.f32.gmra.mxu1 %vm1375_vm7, %v1354_v26  ;;  %v4691_v28 = vsel %vm1268_vm11, %v1253_v17, %v1283_v21  ;;  %3610 = vmatpush3.msra.mxu0 %v4681_v14  ;;  %v1199_v46 = vmax.f32 %v4537_v49, %v1164_v25 }
 0x19f   : > { %v1355_v41 = vrot.slane %v4691_v28, 2  ;;  %3573 = vmatmul.mubr.msk.f32.gmra.mxu0 %vm1375_vm7, %v4691_v28  ;;  %3504 = vmatprep.mubr.msk.f32.mxu1 %vm3997_vm5, %v3995_v23 }
 0x1a0   : > { %vm1269_vm12 = vcmp.ge.f32.partialorder %v1254_v60, 0.0  ;;  %v1284_v31 = vmul.f32 %v4603_v38, %v1254_v60  ;;  %3575 = vmatprep.mubr.msk.f32.mxu0 %vm3997_vm5, %v3995_v23  ;;  %3879 = vmatpush3.msra.mxu1 %v4626_v63 }
 0x1a1   : > { %v1220_v32 = vpop.permute.xlu1 %1219  ;;  %v1166_v35 = vpop.permute.xlu0 %1165  ;;  %v1356_v36 = vsel %vm784_vm3, %v1353_v33, %v1355_v41  ;;  %3867 = vmatprep.subr.mxu1 %v3995_v23  ;;  %3611 = vmatprep.subr.mxu0 %v3995_v23  ;;  %v4812_v33 = vld [vmem:[%s5579_s3 + $0xd8] sm:$0xff] }
 0x1a2   : > { %v1255_v37 = vmax.f32 %v1199_v46, %v1220_v32  ;;  %3505 = vmatmul.mubr.msk.f32.gmra.mxu1 %vm1375_vm7, %v1356_v36  ;;  %v4713_v39 = vsel %vm1269_vm12, %v1254_v60, %v1284_v31  ;;  %3612 = vmatpush3.msra.mxu0 %v4702_v29  ;;  %v1200_v45 = vmax.f32 %v4546_v4, %v1166_v35 }
 0x1a3   : > { %v1357_v49 = vrot.slane %v4713_v39, 2  ;;  %3576 = vmatmul.mubr.msk.f32.gmra.mxu0 %vm1375_vm7, %v4713_v39  ;;  %3507 = vmatprep.mubr.msk.f32.mxu1 %vm3997_vm5, %v3995_v23 }
 0x1a4   : > { %vm1270_vm13 = vcmp.ge.f32.partialorder %v1255_v37, 0.0  ;;  %v1285_v44 = vmul.f32 %v4603_v38, %v1255_v37  ;;  %3578 = vmatprep.mubr.msk.f32.mxu0 %vm3997_vm5, %v3995_v23  ;;  %3880 = vmatpush3.msra.mxu1 %v4638_v54 }
 0x1a5   : > { %v1222_v47 = vpop.permute.xlu1 %1221  ;;  %v1168_v50 = vpop.permute.xlu0 %1167  ;;  %v1358_v53 = vsel %vm784_vm3, %v1355_v41, %v1357_v49  ;;  %3868 = vmatprep.subr.mxu1 %v3995_v23  ;;  %3613 = vmatprep.subr.mxu0 %v3995_v23  ;;  %v3060_v41 = vld [vmem:[%s5579_s3 + $0xd0] sm:$0xff] }
 0x1a6   : > { %v1256_v55 = vmax.f32 %v1200_v45, %v1222_v47  ;;  %3508 = vmatmul.mubr.msk.f32.gmra.mxu1 %vm1375_vm7, %v1358_v53  ;;  %v4735_v42 = vsel %vm1270_vm13, %v1255_v37, %v1285_v44  ;;  %3614 = vmatpush3.msra.mxu0 %v4724_v40  ;;  %v1201_v62 = vmax.f32 %v4556_v13, %v1168_v50  ;;  %v1710_v47 = vrot.slane %v4628_v1, 4 }
 0x1a7   : > { %v1359_v4 = vrot.slane %v4735_v42, 2  ;;  %3579 = vmatmul.mubr.msk.f32.gmra.mxu0 %vm1375_vm7, %v4735_v42  ;;  %3510 = vmatprep.mubr.msk.f32.mxu1 %vm3997_vm5, %v3995_v23 }
 0x1a8   : > { %vm1271_vm14 = vcmp.ge.f32.partialorder %v1256_v55, 0.0  ;;  %v1286_v58 = vmul.f32 %v4603_v38, %v1256_v55  ;;  %3581 = vmatprep.mubr.msk.f32.mxu0 %vm3997_vm5, %v3995_v23  ;;  %3881 = vmatpush3.msra.mxu1 %v4659_v10 }
 0x1a9   : > { %v1224_v59 = vpop.permute.xlu1 %1223  ;;  %v1170_v61 = vpop.permute.xlu0 %1169  ;;  %v1360_v63 = vsel %vm784_vm3, %v1357_v49, %v1359_v4  ;;  %3869 = vmatprep.subr.mxu1 %v3995_v23  ;;  %3615 = vmatprep.subr.mxu0 %v3995_v23 }
 0x1aa   : > { %v1257_v0 = vmax.f32 %v1201_v62, %v1224_v59  ;;  %3511 = vmatmul.mubr.msk.f32.gmra.mxu1 %vm1375_vm7, %v1360_v63  ;;  %v4757_v11 = vsel %vm1271_vm14, %v1256_v55, %v1286_v58  ;;  %3616 = vmatpush3.msra.mxu0 %v4746_v57  ;;  %v1202_v3 = vmax.f32 %v4565_v19, %v1170_v61  ;;  %v1709_v55 = vrot.slane %v4610_v56, 4 }
 0x1ab   : > { %v1361_v13 = vrot.slane %v4757_v11, 2  ;;  %3582 = vmatmul.mubr.msk.f32.gmra.mxu0 %vm1375_vm7, %v4757_v11  ;;  %3513 = vmatprep.mubr.msk.f32.mxu1 %vm3997_vm5, %v3995_v23  ;;  %v1714_v59 = vrot.slane %v4670_v18, 4 }
 0x1ac   : > { %vm1272_vm15 = vcmp.ge.f32.partialorder %v1257_v0, 0.0  ;;  %v1287_v54 = vmul.f32 %v4603_v38, %v1257_v0  ;;  %3584 = vmatprep.mubr.msk.f32.mxu0 %vm3997_vm5, %v3995_v23  ;;  %3882 = vmatpush3.msra.mxu1 %v4681_v14  ;;  %v1711_v62 = vsel %vm1402_vm4, %v1709_v55, %v1710_v47 }
 0x1ad   : > { %v1226_v5 = vpop.permute.xlu1 %1225  ;;  %v1172_v43 = vpop.permute.xlu0 %1171  ;;  %v1362_v6 = vsel %vm784_vm3, %v1359_v4, %v1361_v13  ;;  %3870 = vmatprep.subr.mxu1 %v3995_v23  ;;  %3617 = vmatprep.subr.mxu0 %v3995_v23 }
 0x1ae   : > { %v1258_v7 = vmax.f32 %v1202_v3, %v1226_v5  ;;  %3514 = vmatmul.mubr.msk.f32.gmra.mxu1 %vm1375_vm7, %v1362_v6  ;;  %v4779_v8 = vsel %vm1272_vm15, %v1257_v0, %v1287_v54  ;;  %3618 = vmatpush3.msra.mxu0 %v4768_v2  ;;  %v1203_v48 = vmax.f32 %v4573_v27, %v1172_v43  ;;  %v1720_v0 = vrot.slane %v4735_v42, 4 }
 0x1af   : > { %v1363_v19 = vrot.slane %v4779_v8, 2  ;;  %3585 = vmatmul.mubr.msk.f32.gmra.mxu0 %vm1375_vm7, %v4779_v8  ;;  %3516 = vmatprep.mubr.msk.f32.mxu1 %vm3997_vm5, %v3995_v23  ;;  %v1724_v54 = vrot.slane %v4779_v8, 4 }
 0x1b0   : > { %vm1273_vm0 = vcmp.ge.f32.partialorder %v1258_v7, 0.0  ;;  %v1288_v10 = vmul.f32 %v4603_v38, %v1258_v7  ;;  %3587 = vmatprep.mubr.msk.f32.mxu0 %vm3997_vm5, %v3995_v23  ;;  %3883 = vmatpush3.msra.mxu1 %v4702_v29 }
 0x1b1   : > { %v1228_v12 = vpop.permute.xlu1 %1227  ;;  %v1174_v15 = vpop.permute.xlu0 %1173  ;;  %v1364_v52 = vsel %vm784_vm3, %v1361_v13, %v1363_v19  ;;  %3871 = vmatprep.subr.mxu1 %v3995_v23  ;;  %3619 = vmatprep.subr.mxu0 %v3995_v23  ;;  %v1722_v13 = vrot.slane %v4757_v11, 4 }
 0x1b2   : > { %v1259_v16 = vmax.f32 %v1203_v48, %v1228_v12  ;;  %3517 = vmatmul.mubr.msk.f32.gmra.mxu1 %vm1375_vm7, %v1364_v52  ;;  %v4801_v17 = vsel %vm1273_vm0, %v1258_v7, %v1288_v10  ;;  %3620 = vmatpush3.msra.mxu0 %v4790_v20  ;;  %v1204_v21 = vmax.f32 %v4581_v30, %v1174_v15  ;;  %v1974_v12 = vld [vmem:[%s5581_s5 + $0x28] sm:$0xff]  ;;  %v1973_v15 = vld [vmem:[%s5581_s5 + $0x20] sm:$0xff]  ;;  %v1972_v52 = vld [vmem:[%s5581_s5 + $0x18] sm:$0xff] }
 0x1b3   : > { %v1365_v27 = vrot.slane %v4801_v17, 2  ;;  %3588 = vmatmul.mubr.msk.f32.gmra.mxu0 %vm1375_vm7, %v4801_v17  ;;  %3519 = vmatprep.mubr.msk.f32.mxu1 %vm3997_vm5, %v3995_v23  ;;  %v1723_v42 = vsel %vm1402_vm4, %v1720_v0, %v1722_v13  ;;  %v1726_v3 = vrot.slane %v4801_v17, 4  ;;  %v1725_v11 = vsel %vm1402_vm4, %v1722_v13, %v1724_v54  ;;  %v3094_v17 = vld [vmem:[%s5581_s5 + $0x58] sm:$0xff] }
 0x1b4   : > { %vm1274_vm1 = vcmp.ge.f32.partialorder %v1259_v16, 0.0  ;;  %v1289_v14 = vmul.f32 %v4603_v38, %v1259_v16  ;;  %3590 = vmatprep.mubr.msk.f32.mxu0 %vm3997_vm5, %v3995_v23  ;;  %3884 = vmatpush3.msra.mxu1 %v4724_v40 }
 0x1b5   : > { %v1230_v22 = vpop.permute.xlu1 %1229  ;;  %v1176_v24 = vpop.permute.xlu0 %1175  ;;  %v1366_v25 = vsel %vm784_vm3, %v1363_v19, %v1365_v27  ;;  %3872 = vmatprep.subr.mxu1 %v3995_v23  ;;  %3621 = vmatprep.subr.mxu0 %v3995_v23  ;;  %v1727_v43 = vsel %vm1402_vm4, %v1724_v54, %v1726_v3 }
 0x1b6   : > { %v1260_v26 = vmax.f32 %v1204_v21, %v1230_v22  ;;  %3520 = vmatmul.mubr.msk.f32.gmra.mxu1 %vm1375_vm7, %v1366_v25  ;;  %v4823_v60 = vsel %vm1274_vm1, %v1259_v16, %v1289_v14  ;;  %3622 = vmatpush3.msra.mxu0 %v4812_v33  ;;  %v1205_v31 = vmax.f32 %v4588_v34, %v1176_v24  ;;  %v1971_v16 = vld [vmem:[%s5581_s5 + $0x10] sm:$0xff]  ;;  %v1969_v14 = vld [vmem:[%s5581_s5] sm:$0xff]  ;;  %v3092_v21 = vld [vmem:[%s5581_s5 + $0x48] sm:$0xff] }
 0x1b7   : > { %v1367_v30 = vrot.slane %v4823_v60, 2  ;;  %3591 = vmatmul.mubr.msk.f32.gmra.mxu0 %vm1375_vm7, %v4823_v60  ;;  %3522 = vmatprep.mubr.msk.f32.mxu1 %vm3997_vm5, %v3995_v23  ;;  %v1728_v5 = vrot.slane %v4823_v60, 4  ;;  %v3091_v22 = vld [vmem:[%s5581_s5 + $0x40] sm:$0xff]  ;;  %v3090_v24 = vld [vmem:[%s5581_s5 + $0x38] sm:$0xff]  ;;  %v3089_v25 = vld [vmem:[%s5581_s5 + $0x30] sm:$0xff] }
 0x1b8   : > { %vm1275_vm2 = vcmp.ge.f32.partialorder %v1260_v26, 0.0  ;;  %v1290_v29 = vmul.f32 %v4603_v38, %v1260_v26  ;;  %3593 = vmatprep.mubr.msk.f32.mxu0 %vm3997_vm5, %v3995_v23  ;;  %3885 = vmatpush3.msra.mxu1 %v4746_v57  ;;  %v1712_v57 = vrot.slane %v4648_v9, 4 }
 0x1b9   : > { %v1232_v46 = vpop.permute.xlu1 %1231  ;;  %v1178_v32 = vpop.permute.xlu0 %1177  ;;  %v1368_v35 = vsel %vm784_vm3, %v1365_v27, %v1367_v30  ;;  %3873 = vmatprep.subr.mxu1 %v3995_v23  ;;  %3623 = vmatprep.subr.mxu0 %v3995_v23  ;;  %v1729_v7 = vsel %vm1402_vm4, %v1726_v3, %v1728_v5  ;;  %v1970_v27 = vld [vmem:[%s5581_s5 + $0x8] sm:$0xff] }
 0x1ba   : > { %v1261_v36 = vmax.f32 %v1205_v31, %v1232_v46  ;;  %3523 = vmatmul.mubr.msk.f32.gmra.mxu1 %vm1375_vm7, %v1368_v35  ;;  %v4843_v37 = vsel %vm1275_vm2, %v1260_v26, %v1290_v29  ;;  %3624 = vmatpush3.msra.mxu0 %v3060_v41  ;;  %v1206_v40 = vmax.f32 %v4594_v51, %v1178_v32 }
 0x1bb   : > { %v1369_v34 = vrot.slane %v4843_v37, 2  ;;  %3594 = vmatmul.mubr.msk.f32.gmra.mxu0 %vm1375_vm7, %v4843_v37  ;;  %3525 = vmatprep.mubr.msk.f32.mxu1 %vm3997_vm5, %v3995_v23  ;;  %v1713_v61 = vsel %vm1402_vm4, %v1710_v47, %v1712_v57  ;;  %v1715_v18 = vsel %vm1402_vm4, %v1712_v57, %v1714_v59  ;;  %v1730_v6 = vrot.slane %v4843_v37, 4 }
 0x1bc   : > { %vm1276_vm6 = vcmp.ge.f32.partialorder %v1261_v36, 0.0  ;;  %v1291_v49 = vmul.f32 %v4603_v38, %v1261_v36  ;;  %3596 = vmatprep.mubr.msk.f32.mxu0 %vm3997_vm5, %v3995_v23  ;;  %3886 = vmatpush3.msra.mxu1 %v4768_v2 }
 0x1bd   : > { %v1234_v44 = vpop.permute.xlu1 %1233  ;;  %v1370_v45 = vsel %vm784_vm3, %v1367_v30, %v1369_v34  ;;  %3874 = vmatprep.subr.mxu1 %v3995_v23  ;;  %3664 = vmatprep.subr.mxu0 %v3995_v23  ;;  %v1731_v19 = vsel %vm1402_vm4, %v1728_v5, %v1730_v6 }
 0x1be   : > { %v1262_v50 = vmax.f32 %v1206_v40, %v1234_v44  ;;  %3526 = vmatmul.mubr.msk.f32.gmra.mxu1 %vm1375_vm7, %v1370_v45  ;;  %v4860_v53 = vsel %vm1276_vm6, %v1261_v36, %v1291_v49 }
 0x1bf   : > { %v1371_v51 = vrot.slane %v4860_v53, 2  ;;  %3597 = vmatmul.mubr.msk.f32.gmra.mxu0 %vm1375_vm7, %v4860_v53  ;;  %3528 = vmatprep.mubr.msk.f32.mxu1 %vm3997_vm5, %v3995_v23  ;;  %v1732_v8 = vrot.slane %v4860_v53, 4 }
 0x1c0   : > { %vm1277_vm8 = vcmp.ge.f32.partialorder %v1262_v50, 0.0  ;;  %v1292_v4 = vmul.f32 %v4603_v38, %v1262_v50  ;;  %3625 = vmatprep.mubr.msk.f32.mxu0 %vm3997_vm5, %v3995_v23  ;;  %3887 = vmatpush3.msra.mxu1 %v4790_v20  ;;  %v1716_v38 = vrot.slane %v4691_v28, 4  ;;  %v1718_v28 = vrot.slane %v4713_v39, 4 }
 0x1c1   : > { %v1372_v1 = vsel %vm784_vm3, %v1369_v34, %v1371_v51  ;;  %3875 = vmatprep.subr.mxu1 %v3995_v23  ;;  %v1733_v10 = vsel %vm1402_vm4, %v1730_v6, %v1732_v8 }
 0x1c2   : > { %v1306_v58 = vsel %vm1277_vm8, %v1262_v50, %v1292_v4  ;;  %3529 = vmatmul.mubr.msk.f32.gmra.mxu1 %vm1375_vm7, %v1372_v1  ;;  %v1717_v63 = vsel %vm1402_vm4, %v1714_v59, %v1716_v38  ;;  %v1719_v39 = vsel %vm1402_vm4, %v1716_v38, %v1718_v28  ;;  %v1721_v2 = vsel %vm1402_vm4, %v1718_v28, %v1720_v0 }
 0x1c3   : > { %v1373_v56 = vrot.slane %v1306_v58, 2  ;;  %3626 = vmatmul.mubr.msk.f32.vlgmr.msra.gmra.mxu0 %vm1375_vm7, %v1711_v62  ;;  %3531 = vmatprep.mubr.msk.f32.mxu1 %vm3997_vm5, %v3995_v23  ;;  %v1734_v20 = vrot.slane %v1306_v58, 4 }
 0x1c4   : > { %3628 = vmatprep.mubr.msk.f32.mxu0 %vm3997_vm5, %v3995_v23  ;;  %3888 = vmatpush3.msra.mxu1 %v4812_v33  ;;  %v3093_v33 = vld [vmem:[%s5581_s5 + $0x50] sm:$0xff] }
 0x1c5   : > { %v1374_v9 = vsel %vm784_vm3, %v1371_v51, %v1373_v56  ;;  %3876 = vmatprep.subr.mxu1 %v3995_v23  ;;  %v1735_v48 = vsel %vm1402_vm4, %v1732_v8, %v1734_v20  ;;  %3665 = vmatpush3.msra.mxu0 %v3094_v17 }
 0x1c6   : > { %3532 = vmatmul.mubr.msk.f32.gmra.mxu1 %vm1375_vm7, %v1374_v9  ;;  %3666 = vmatprep.subr.mxu0 %v3995_v23 }
 0x1c7   : > { %3629 = vmatmul.mubr.msk.f32.gmra.mxu0 %vm1375_vm7, %v1713_v61  ;;  %3889 = vmatpush3.msra.mxu1 %v3060_v41 }
 0x1c8   : > { %3634 = vmatprep.mubr.msk.f32.mxu1 %vm3997_vm5, %v3995_v23  ;;  %3631 = vmatprep.mubr.msk.f32.mxu0 %vm3997_vm5, %v3995_v23 }
 0x1c9   : > { %3715 = vmatprep.subr.mxu1 %v3995_v23  ;;  %3667 = vmatpush3.msra.mxu0 %v3093_v33 }
 0x1ca   : > { %3635 = vmatmul.mubr.msk.f32.vlgmr.msra.gmra.mxu1 %vm1375_vm7, %v1717_v63  ;;  %3668 = vmatprep.subr.mxu0 %v3995_v23 }
 0x1cb   : > { %3632 = vmatmul.mubr.msk.f32.gmra.mxu0 %vm1375_vm7, %v1715_v18  ;;  %3637 = vmatprep.mubr.msk.f32.mxu1 %vm3997_vm5, %v3995_v23 }
 0x1cc   : > { %3676 = vmatprep.mubr.msk.f32.mxu0 %vm3997_vm5, %v3995_v23  ;;  %3716 = vmatpush3.msra.mxu1 %v1974_v12  ;;  %v5032_v12 = vld [vmem:[%s5580_s4] ss:$0 sm:$0xff] }
 0x1cd   : > { %3717 = vmatprep.subr.mxu1 %v3995_v23  ;;  %3669 = vmatpush3.msra.mxu0 %v3092_v21 }
 0x1ce   : > { %3638 = vmatmul.mubr.msk.f32.gmra.mxu1 %vm1375_vm7, %v1719_v39  ;;  %3670 = vmatprep.subr.mxu0 %v3995_v23 }
 0x1cf   : > { %3640 = vmatprep.mubr.msk.f32.mxu1 %vm3997_vm5, %v3995_v23  ;;  %3718 = vmatpush3.msra.mxu1 %v1973_v15 }
 0x1d0   : > { %3719 = vmatprep.subr.mxu1 %v3995_v23  ;;  %3671 = vmatpush3.msra.mxu0 %v3091_v22 }
 0x1d1   : > { %3720 = vmatpush3.msra.mxu1 %v1972_v52  ;;  %3672 = vmatprep.subr.mxu0 %v3995_v23 }
 0x1d2   : > { %3641 = vmatmul.mubr.msk.f32.gmra.mxu1 %vm1375_vm7, %v1721_v2  ;;  %3721 = vmatprep.subr.mxu1 %v3995_v23 }
 0x1d3   : > { %3643 = vmatprep.mubr.msk.f32.mxu1 %vm3997_vm5, %v3995_v23  ;;  %3722 = vmatpush3.msra.mxu1 %v1971_v16  ;;  %v5034_v16 = vstv %s3088_s24 }
 0x1d4   : > { %3723 = vmatprep.subr.mxu1 %v3995_v23  ;;  %3673 = vmatpush3.msra.mxu0 %v3090_v24 }
 0x1d5   : > { %3724 = vmatpush3.msra.mxu1 %v1970_v27  ;;  %3674 = vmatprep.subr.mxu0 %v3995_v23 }
 0x1d6   : > { %3644 = vmatmul.mubr.msk.f32.gmra.mxu1 %vm1375_vm7, %v1723_v42  ;;  %3725 = vmatprep.subr.mxu1 %v3995_v23 }
 0x1d7   : > { %3646 = vmatprep.mubr.msk.f32.mxu1 %vm3997_vm5, %v3995_v23  ;;  %3726 = vmatpush3.msra.mxu1 %v1969_v14 }
 0x1d8   : > { %3817 = vmatprep.subr.mxu1 %v3995_v23  ;;  %3675 = vmatpush3.msra.mxu0 %v3089_v25 }
 0x1d9   : > { %3766 = vmatprep.subr.mxu0 %v3995_v23 }
 0x1da   : > { %3647 = vmatmul.mubr.msk.f32.gmra.mxu1 %vm1375_vm7, %v1725_v11 }
 0x1db   : > { %3649 = vmatprep.mubr.msk.f32.mxu1 %vm3997_vm5, %v3995_v23 }
 0x1de   : > { %3650 = vmatmul.mubr.msk.f32.gmra.mxu1 %vm1375_vm7, %v1727_v43 }
 0x1df   : > { %3652 = vmatprep.mubr.msk.f32.mxu1 %vm3997_vm5, %v3995_v23 }
 0x1e2   : > { %3653 = vmatmul.mubr.msk.f32.gmra.mxu1 %vm1375_vm7, %v1729_v7 }
 0x1e3   : > { %3655 = vmatprep.mubr.msk.f32.mxu1 %vm3997_vm5, %v3995_v23 }
 0x1e6   : > { %3656 = vmatmul.mubr.msk.f32.gmra.mxu1 %vm1375_vm7, %v1731_v19 }
 0x1e7   : > { %3658 = vmatprep.mubr.msk.f32.mxu1 %vm3997_vm5, %v3995_v23 }
 0x1ea   : > { %3659 = vmatmul.mubr.msk.f32.gmra.mxu1 %vm1375_vm7, %v1733_v10 }
 0x1eb   : > { %3661 = vmatprep.mubr.msk.f32.mxu1 %vm3997_vm5, %v3995_v23 }
 0x1ee   : > { %3662 = vmatmul.mubr.msk.f32.gmra.mxu1 %vm1375_vm7, %v1735_v48 }
 0x1ef   : > { %3727 = vmatprep.mubr.msk.f32.mxu1 %vm3997_vm5, %v3995_v23 }
 0x24f   : > { %v1631_v26 = vpop.f32.mrf.mxu0 }
 0x251   : > { %v3562_v60 = vpop.f32.mrf.mxu0 }
 0x253   : > { %v1636_v30 = vpop.f32.mrf.mxu0 }
 0x255   : > { %v3565_v41 = vpop.f32.mrf.mxu0 }
 0x256   : > { %v1472_v29 = vpop.f32.mrf.mxu1 }
 0x257   : > { %v4995_v31 = vpop.f32.mrf.mxu0  ;;  %v1632_v20 = vadd.f32 %v1631_v26, %v1472_v29 }
 0x258   : > { %v3497_v46 = vpop.f32.mrf.mxu1 }
 0x259   : > { %v3568_v32 = vpop.f32.mrf.mxu0 }
 0x25a   : > { %v1477_v35 = vpop.f32.mrf.mxu1 }
 0x25b   : > { %v1646_v36 = vpop.f32.mrf.mxu0  ;;  %v1637_v27 = vadd.f32 %v1636_v30, %v1477_v35 }
 0x25c   : > { %v3500_v37 = vpop.f32.mrf.mxu1 }
 0x25d   : > { %v3571_v34 = vpop.f32.mrf.mxu0 }
 0x25e   : > { %v1482_v49 = vpop.f32.mrf.mxu1 }
 0x25f   : > { %v4997_v40 = vpop.f32.mrf.mxu0  ;;  %v1642_v41 = vadd.f32 %v4995_v31, %v1482_v49 }
 0x260   : > { %v3503_v44 = vpop.f32.mrf.mxu1 }
 0x261   : > { %v3574_v45 = vpop.f32.mrf.mxu0 }
 0x262   : > { %v1487_v47 = vpop.f32.mrf.mxu1 }
 0x263   : > { %v4999_v50 = vpop.f32.mrf.mxu0  ;;  %v1647_v26 = vadd.f32 %v1646_v36, %v1487_v47 }
 0x264   : > { %v3506_v53 = vpop.f32.mrf.mxu1 }
 0x265   : > { %v3577_v51 = vpop.f32.mrf.mxu0 }
 0x266   : > { %v1492_v55 = vpop.f32.mrf.mxu1 }
 0x267   : > { %v5001_v4 = vpop.f32.mrf.mxu0  ;;  %v1652_v31 = vadd.f32 %v4997_v40, %v1492_v55 }
 0x268   : > { %v3509_v1 = vpop.f32.mrf.mxu1 }
 0x269   : > { %v3580_v57 = vpop.f32.mrf.mxu0 }
 0x26a   : > { %v5003_v58 = vpop.f32.mrf.mxu1 }
 0x26b   : > { %v5005_v62 = vpop.f32.mrf.mxu0 }
 0x26c   : > { %v3512_v56 = vpop.f32.mrf.mxu1 }
 0x26d   : > { %v3583_v38 = vpop.f32.mrf.mxu0 }
 0x26e   : > { %v5007_v9 = vpop.f32.mrf.mxu1  ;;  %v3126_v38 = vld [vmem:[%s5581_s5 + $0x88] sm:$0xff] }
 0x26f   : > { %v5009_v59 = vpop.f32.mrf.mxu0 }
 0x270   : > { %v3515_v61 = vpop.f32.mrf.mxu1 }
 0x271   : > { %v3586_v28 = vpop.f32.mrf.mxu0  ;;  %v1657_v61 = vadd.f32 %v4999_v50, %v5003_v58  ;;  %v1662_v58 = vadd.f32 %v5001_v4, %v5007_v9 }
 0x272   : > { %v5011_v63 = vpop.f32.mrf.mxu1 }
 0x273   : > { %v5013_v18 = vpop.f32.mrf.mxu0 }
 0x274   : > { %v3518_v0 = vpop.f32.mrf.mxu1 }
 0x275   : > { %v3589_v39 = vpop.f32.mrf.mxu0 }
 0x276   : > { %v5015_v13 = vpop.f32.mrf.mxu1 }
 0x277   : > { %v5017_v2 = vpop.f32.mrf.mxu0 }
 0x278   : > { %v3521_v54 = vpop.f32.mrf.mxu1 }
 0x279   : > { %v3592_v42 = vpop.f32.mrf.mxu0 }
 0x27a   : > { %v5019_v3 = vpop.f32.mrf.mxu1 }
 0x27b   : > { %v5021_v11 = vpop.f32.mrf.mxu0 }
 0x27c   : > { %v3524_v5 = vpop.f32.mrf.mxu1 }
 0x27d   : > { %v3595_v43 = vpop.f32.mrf.mxu0 }
 0x27e   : > { %v5023_v6 = vpop.f32.mrf.mxu1 }
 0x27f   : > { %v5025_v7 = vpop.f32.mrf.mxu0 }
 0x280   : > { %v3527_v8 = vpop.f32.mrf.mxu1 }
 0x281   : > { %v3598_v19 = vpop.f32.mrf.mxu0 }
 0x282   : > { %v5027_v10 = vpop.f32.mrf.mxu1 }
 0x283   : > { %v1831_v48 = vpop.f32.mrf.mxu0 }
 0x284   : > { %v1895_v15 = vadd.f32 %v1831_v48, %v1632_v20  ;;  %v3530_v52 = vpop.f32.mrf.mxu1 }
 0x285   : > { %v3627_v17 = vpop.f32.mrf.mxu0 }
 0x286   : > { %v1915_v33 = vadd.f32 %v5032_v12, %v1895_v15  ;;  %v5037_v14 = vpop.f32.mrf.mxu1  ;;  %v3125_v15 = vld [vmem:[%s5581_s5 + $0x80] sm:$0xff] }
 0x287   : > { %v1836_v21 = vpop.f32.mrf.mxu0 }
 0x288   : > { %vm1929_vm7 = vcmp.ge.f32.partialorder %v1915_v33, 0.0  ;;  %v1943_v22 = vmul.f32 %v5034_v16, %v1915_v33  ;;  %v1896_v24 = vadd.f32 %v1836_v21, %v1637_v27  ;;  %v3533_v25 = vpop.f32.mrf.mxu1 }
 0x289   : > { %v3630_v60 = vpop.f32.mrf.mxu0  ;;  %v3124_v25 = vld [vmem:[%s5581_s5 + $0x78] sm:$0xff] }
 0x28a   : > { %v5041_v29 = vsel %vm1929_vm7, %v1915_v33, %v1943_v22  ;;  %v1916_v46 = vadd.f32 %v5032_v12, %v1896_v24  ;;  %v1846_v30 = vpop.f32.mrf.mxu1  ;;  %v1667_v33 = vadd.f32 %v5005_v62, %v5011_v63 }
 0x28b   : > { %v1898_v32 = vadd.f32 %v1846_v30, %v1647_v26  ;;  %v1841_v35 = vpop.f32.mrf.mxu0  ;;  %3728 = vmatmul.mubr.msk.f32.vlgmr.msra.gmra.mxu1 %vm2020_vm9, %v5041_v29  ;;  %v1995_v51 = vrot.slane %v5041_v29, 2 }
 0x28c   : > { %v1944_v37 = vmul.f32 %v5034_v16, %v1916_v46  ;;  %v1897_v34 = vadd.f32 %v1841_v35, %v1642_v41  ;;  %v3636_v44 = vpop.f32.mrf.mxu1  ;;  %3730 = vmatprep.mubr.msk.f32.mxu1 %vm3997_vm5, %v3995_v23  ;;  %vm1930_vm10 = vcmp.ge.f32.partialorder %v1916_v46, 0.0 }
 0x28d   : > { %v1918_v36 = vadd.f32 %v5032_v12, %v1898_v32  ;;  %v3633_v49 = vpop.f32.mrf.mxu0 }
 0x28e   : > { %v1917_v45 = vadd.f32 %v5032_v12, %v1897_v34  ;;  %v1851_v47 = vpop.f32.mrf.mxu1  ;;  %v5052_v53 = vsel %vm1930_vm10, %v1916_v46, %v1944_v37  ;;  %v1672_v46 = vadd.f32 %v5009_v59, %v5015_v13  ;;  %v3123_v37 = vld [vmem:[%s5581_s5 + $0x70] sm:$0xff] }
 0x28f   : > { %v1946_v1 = vmul.f32 %v5034_v16, %v1918_v36  ;;  %v1899_v57 = vadd.f32 %v1851_v47, %v1652_v31  ;;  %v1996_v56 = vrot.slane %v5052_v53, 2  ;;  %3731 = vmatmul.mubr.msk.f32.gmra.mxu1 %vm2020_vm9, %v5052_v53  ;;  %vm1932_vm12 = vcmp.ge.f32.partialorder %v1918_v36, 0.0 }
 0x290   : > { %v1945_v40 = vmul.f32 %v5034_v16, %v1917_v45  ;;  %v3639_v55 = vpop.f32.mrf.mxu1  ;;  %3733 = vmatprep.mubr.msk.f32.mxu1 %vm3997_vm5, %v3995_v23  ;;  %vm1931_vm11 = vcmp.ge.f32.partialorder %v1917_v45, 0.0 }
 0x291   : > { %v1919_v28 = vadd.f32 %v5032_v12, %v1899_v57  ;;  %v1997_v0 = vsel %vm784_vm3, %v1995_v51, %v1996_v56  ;;  %v5072_v42 = vsel %vm1932_vm12, %v1918_v36, %v1946_v1  ;;  %v1677_v36 = vadd.f32 %v5013_v18, %v5019_v3  ;;  %v3122_v51 = vld [vmem:[%s5581_s5 + $0x68] sm:$0xff] }
 0x292   : > { %v1856_v39 = vpop.f32.mrf.mxu1  ;;  %3677 = vmatmul.mubr.msk.f32.vlgmr.msra.gmra.mxu0 %vm2020_vm9, %v1997_v0  ;;  %v5070_v54 = vsel %vm1931_vm11, %v1917_v45, %v1945_v40  ;;  %v2000_v48 = vrot.slane %v5072_v42, 2  ;;  %v1682_v40 = vadd.f32 %v5017_v2, %v5023_v6 }
 0x293   : > { %v1947_v5 = vmul.f32 %v5034_v16, %v1919_v28  ;;  %v1900_v43 = vadd.f32 %v1856_v39, %v1657_v61  ;;  %v1998_v8 = vrot.slane %v5070_v54, 2  ;;  %3734 = vmatmul.mubr.msk.f32.gmra.mxu1 %vm2020_vm9, %v5070_v54  ;;  %3767 = vmatpush3.msra.mxu0 %v3126_v38  ;;  %vm1933_vm13 = vcmp.ge.f32.partialorder %v1919_v28, 0.0 }
 0x294   : > { %v3642_v50 = vpop.f32.mrf.mxu1  ;;  %3679 = vmatprep.mubr.msk.f32.mxu0 %vm3997_vm5, %v3995_v23  ;;  %3736 = vmatprep.mubr.msk.f32.mxu1 %vm3997_vm5, %v3995_v23 }
 0x295   : > { %v1920_v19 = vadd.f32 %v5032_v12, %v1900_v43  ;;  %v1999_v20 = vsel %vm784_vm3, %v1996_v56, %v1998_v8  ;;  %3768 = vmatprep.subr.mxu0 %v3995_v23  ;;  %v5092_v17 = vsel %vm1933_vm13, %v1919_v28, %v1947_v5  ;;  %v2001_v22 = vsel %vm784_vm3, %v1998_v8, %v2000_v48  ;;  %v3121_v28 = vld [vmem:[%s5581_s5 + $0x60] sm:$0xff] }
 0x296   : > { %v1861_v52 = vpop.f32.mrf.mxu1  ;;  %3680 = vmatmul.mubr.msk.f32.gmra.mxu0 %vm2020_vm9, %v1999_v20  ;;  %v2002_v24 = vrot.slane %v5092_v17, 2  ;;  %v1687_v43 = vadd.f32 %v5021_v11, %v5027_v10  ;;  %v1692_v10 = vadd.f32 %v5025_v7, %v5037_v14 }
 0x297   : > { %v1948_v27 = vmul.f32 %v5034_v16, %v1920_v19  ;;  %v1901_v4 = vadd.f32 %v1861_v52, %v1662_v58  ;;  %3737 = vmatmul.mubr.msk.f32.gmra.mxu1 %vm2020_vm9, %v5072_v42  ;;  %3682 = vmatprep.mubr.msk.f32.mxu0 %vm3997_vm5, %v3995_v23  ;;  %vm1934_vm14 = vcmp.ge.f32.partialorder %v1920_v19, 0.0 }
 0x298   : > { %v3645_v9 = vpop.f32.mrf.mxu1  ;;  %3739 = vmatprep.mubr.msk.f32.mxu1 %vm3997_vm5, %v3995_v23  ;;  %3769 = vmatpush3.msra.mxu0 %v3125_v15  ;;  %v2003_v32 = vsel %vm784_vm3, %v2000_v48, %v2002_v24 }
 0x299   : > { %v1921_v21 = vadd.f32 %v5032_v12, %v1901_v4  ;;  %3770 = vmatprep.subr.mxu0 %v3995_v23  ;;  %v5111_v60 = vsel %vm1934_vm14, %v1920_v19, %v1948_v27 }
 0x29a   : > { %v1866_v26 = vpop.f32.mrf.mxu1  ;;  %3683 = vmatmul.mubr.msk.f32.gmra.mxu0 %vm2020_vm9, %v2001_v22  ;;  %v2004_v35 = vrot.slane %v5111_v60, 2 }
 0x29b   : > { %v1949_v41 = vmul.f32 %v5034_v16, %v1921_v21  ;;  %v1902_v62 = vadd.f32 %v1866_v26, %v1667_v33  ;;  %3740 = vmatmul.mubr.msk.f32.gmra.mxu1 %vm2020_vm9, %v5092_v17  ;;  %3685 = vmatprep.mubr.msk.f32.mxu0 %vm3997_vm5, %v3995_v23  ;;  %vm1935_vm15 = vcmp.ge.f32.partialorder %v1921_v21, 0.0 }
 0x29c   : > { %v3648_v63 = vpop.f32.mrf.mxu1  ;;  %3742 = vmatprep.mubr.msk.f32.mxu1 %vm3997_vm5, %v3995_v23  ;;  %3771 = vmatpush3.msra.mxu0 %v3124_v25  ;;  %v2005_v45 = vsel %vm784_vm3, %v2002_v24, %v2004_v35 }
 0x29d   : > { %v1922_v30 = vadd.f32 %v5032_v12, %v1902_v62  ;;  %3772 = vmatprep.subr.mxu0 %v3995_v23  ;;  %v5130_v44 = vsel %vm1935_vm15, %v1921_v21, %v1949_v41 }
 0x29e   : > { %v1871_v34 = vpop.f32.mrf.mxu1  ;;  %3686 = vmatmul.mubr.msk.f32.gmra.mxu0 %vm2020_vm9, %v2003_v32  ;;  %v2006_v47 = vrot.slane %v5130_v44, 2  ;;  %v2341_v32 = vrot.slane %v5052_v53, 4 }
 0x29f   : > { %v1950_v31 = vmul.f32 %v5034_v16, %v1922_v30  ;;  %v1903_v59 = vadd.f32 %v1871_v34, %v1672_v46  ;;  %3743 = vmatmul.mubr.msk.f32.gmra.mxu1 %vm2020_vm9, %v5111_v60  ;;  %3688 = vmatprep.mubr.msk.f32.mxu0 %vm3997_vm5, %v3995_v23  ;;  %vm1936_vm0 = vcmp.ge.f32.partialorder %v1922_v30, 0.0 }
 0x2a0   : > { %v3651_v13 = vpop.f32.mrf.mxu1  ;;  %3745 = vmatprep.mubr.msk.f32.mxu1 %vm3997_vm5, %v3995_v23  ;;  %3773 = vmatpush3.msra.mxu0 %v3123_v37  ;;  %v2007_v38 = vsel %vm784_vm3, %v2004_v35, %v2006_v47  ;;  %v2340_v35 = vrot.slane %v5041_v29, 4  ;;  %v2343_v37 = vrot.slane %v5070_v54, 4  ;;  %v2347_v29 = vrot.slane %v5092_v17, 4 }
 0x2a1   : > { %v1923_v49 = vadd.f32 %v5032_v12, %v1903_v59  ;;  %3774 = vmatprep.subr.mxu0 %v3995_v23  ;;  %v5149_v57 = vsel %vm1936_vm0, %v1922_v30, %v1950_v31  ;;  %v2345_v31 = vrot.slane %v5072_v42, 4  ;;  %v2349_v59 = vrot.slane %v5111_v60, 4 }
 0x2a2   : > { %v1876_v1 = vpop.f32.mrf.mxu1  ;;  %3689 = vmatmul.mubr.msk.f32.gmra.mxu0 %vm2020_vm9, %v2005_v45  ;;  %v2008_v61 = vrot.slane %v5149_v57, 2  ;;  %v2342_v34 = vsel %vm1402_vm4, %v2340_v35, %v2341_v32  ;;  %v2344_v53 = vsel %vm1402_vm4, %v2341_v32, %v2343_v37  ;;  %v2351_v13 = vrot.slane %v5130_v44, 4 }
 0x2a3   : > { %v1951_v56 = vmul.f32 %v5034_v16, %v1923_v49  ;;  %v1904_v18 = vadd.f32 %v1876_v1, %v1677_v36  ;;  %3746 = vmatmul.mubr.msk.f32.gmra.mxu1 %vm2020_vm9, %v5130_v44  ;;  %3691 = vmatprep.mubr.msk.f32.mxu0 %vm3997_vm5, %v3995_v23  ;;  %vm1937_vm1 = vcmp.ge.f32.partialorder %v1923_v49, 0.0  ;;  %v2346_v54 = vsel %vm1402_vm4, %v2343_v37, %v2345_v31  ;;  %v2598_v44 = vld [vmem:[%s5583_s7 + $0x18] sm:$0xff] }
 0x2a4   : > { %v3654_v3 = vpop.f32.mrf.mxu1  ;;  %3748 = vmatprep.mubr.msk.f32.mxu1 %vm3997_vm5, %v3995_v23  ;;  %3775 = vmatpush3.msra.mxu0 %v3122_v51  ;;  %v2009_v50 = vsel %vm784_vm3, %v2006_v47, %v2008_v61  ;;  %v2348_v42 = vsel %vm1402_vm4, %v2345_v31, %v2347_v29  ;;  %v2350_v17 = vsel %vm1402_vm4, %v2347_v29, %v2349_v59  ;;  %v2353_v36 = vrot.slane %v5149_v57, 4 }
 0x2a5   : > { %v1924_v55 = vadd.f32 %v5032_v12, %v1904_v18  ;;  %3776 = vmatprep.subr.mxu0 %v3995_v23  ;;  %v5168_v39 = vsel %vm1937_vm1, %v1923_v49, %v1951_v56  ;;  %v2352_v60 = vsel %vm1402_vm4, %v2349_v59, %v2351_v13  ;;  %3818 = vmatpush3.msra.mxu1 %v2598_v44  ;;  %v2597_v56 = vld [vmem:[%s5583_s7 + $0x10] sm:$0xff] }
 0x2a6   : > { %v1881_v0 = vpop.f32.mrf.mxu1  ;;  %3692 = vmatmul.mubr.msk.f32.gmra.mxu0 %vm2020_vm9, %v2007_v38  ;;  %v2010_v58 = vrot.slane %v5168_v39, 2  ;;  %v2355_v49 = vrot.slane %v5168_v39, 4  ;;  %v2354_v45 = vsel %vm1402_vm4, %v2351_v13, %v2353_v36  ;;  %3819 = vmatprep.subr.mxu1 %v3995_v23 }
 0x2a7   : > { %v1952_v5 = vmul.f32 %v5034_v16, %v1924_v55  ;;  %v1905_v2 = vadd.f32 %v1881_v0, %v1682_v40  ;;  %3749 = vmatmul.mubr.msk.f32.gmra.mxu1 %vm2020_vm9, %v5149_v57  ;;  %3694 = vmatprep.mubr.msk.f32.mxu0 %vm3997_vm5, %v3995_v23  ;;  %vm1938_vm2 = vcmp.ge.f32.partialorder %v1924_v55, 0.0 }
 0x2a8   : > { %v3657_v6 = vpop.f32.mrf.mxu1  ;;  %3751 = vmatprep.mubr.msk.f32.mxu1 %vm3997_vm5, %v3995_v23  ;;  %3777 = vmatpush3.msra.mxu0 %v3121_v28  ;;  %v2011_v27 = vsel %vm784_vm3, %v2008_v61, %v2010_v58  ;;  %v2356_v51 = vsel %vm1402_vm4, %v2353_v36, %v2355_v49  ;;  %v2596_v61 = vld [vmem:[%s5583_s7 + $0x8] sm:$0xff]  ;;  %v2595_v28 = vld [vmem:[%s5583_s7] sm:$0xff] }
 0x2a9   : > { %v1925_v8 = vadd.f32 %v5032_v12, %v1905_v2  ;;  %v5183_v20 = vsel %vm1938_vm2, %v1924_v55, %v1952_v5  ;;  %3820 = vmatpush3.msra.mxu1 %v2597_v56 }
 0x2aa   : > { %v1886_v19 = vpop.f32.mrf.mxu1  ;;  %3695 = vmatmul.mubr.msk.f32.gmra.mxu0 %vm2020_vm9, %v2009_v50  ;;  %v2012_v4 = vrot.slane %v5183_v20, 2  ;;  %v2357_v47 = vrot.slane %v5183_v20, 4  ;;  %3821 = vmatprep.subr.mxu1 %v3995_v23 }
 0x2ab   : > { %v1953_v48 = vmul.f32 %v5034_v16, %v1925_v8  ;;  %v1906_v15 = vadd.f32 %v1886_v19, %v1687_v43  ;;  %3752 = vmatmul.mubr.msk.f32.gmra.mxu1 %vm2020_vm9, %v5168_v39  ;;  %3697 = vmatprep.mubr.msk.f32.mxu0 %vm3997_vm5, %v3995_v23  ;;  %vm1939_vm6 = vcmp.ge.f32.partialorder %v1925_v8, 0.0 }
 0x2ac   : > { %v3660_v11 = vpop.f32.mrf.mxu1  ;;  %3754 = vmatprep.mubr.msk.f32.mxu1 %vm3997_vm5, %v3995_v23  ;;  %v2013_v24 = vsel %vm784_vm3, %v2010_v58, %v2012_v4  ;;  %v2358_v57 = vsel %vm1402_vm4, %v2355_v49, %v2357_v47  ;;  %3822 = vmatpush3.msra.mxu1 %v2596_v61 }
 0x2ad   : > { %v1926_v52 = vadd.f32 %v5032_v12, %v1906_v15  ;;  %v5198_v33 = vsel %vm1939_vm6, %v1925_v8, %v1953_v48  ;;  %3823 = vmatprep.subr.mxu1 %v3995_v23 }
 0x2ae   : > { %v1891_v9 = vpop.f32.mrf.mxu1  ;;  %3698 = vmatmul.mubr.msk.f32.gmra.mxu0 %vm2020_vm9, %v2011_v27  ;;  %v2014_v25 = vrot.slane %v5198_v33, 2  ;;  %v2359_v1 = vrot.slane %v5198_v33, 4  ;;  %3824 = vmatpush3.msra.mxu1 %v2595_v28 }
 0x2af   : > { %v1954_v21 = vmul.f32 %v5034_v16, %v1926_v52  ;;  %v1907_v22 = vadd.f32 %v1891_v9, %v1692_v10  ;;  %3755 = vmatmul.mubr.msk.f32.gmra.mxu1 %vm2020_vm9, %v5183_v20  ;;  %3700 = vmatprep.mubr.msk.f32.mxu0 %vm3997_vm5, %v3995_v23  ;;  %vm1940_vm8 = vcmp.ge.f32.partialorder %v1926_v52, 0.0 }
 0x2b0   : > { %v3663_v7 = vpop.f32.mrf.mxu1  ;;  %3757 = vmatprep.mubr.msk.f32.mxu1 %vm3997_vm5, %v3995_v23  ;;  %v2360_v3 = vsel %vm1402_vm4, %v2357_v47, %v2359_v1 }
 0x2b1   : > { %v1927_v14 = vadd.f32 %v5032_v12, %v1907_v22  ;;  %v5211_v26 = vsel %vm1940_vm8, %v1926_v52, %v1954_v21  ;;  %v2015_v12 = vsel %vm784_vm3, %v2012_v4, %v2014_v25 }
 0x2b2   : > { %3701 = vmatmul.mubr.msk.f32.gmra.mxu0 %vm2020_vm9, %v2013_v24  ;;  %v2016_v62 = vrot.slane %v5211_v26, 2  ;;  %v2361_v18 = vrot.slane %v5211_v26, 4 }
 0x2b3   : > { %v1955_v41 = vmul.f32 %v5034_v16, %v1927_v14  ;;  %3758 = vmatmul.mubr.msk.f32.gmra.mxu1 %vm2020_vm9, %v5198_v33  ;;  %3703 = vmatprep.mubr.msk.f32.mxu0 %vm3997_vm5, %v3995_v23  ;;  %vm1941_vm7 = vcmp.ge.f32.partialorder %v1927_v14, 0.0 }
 0x2b4   : > { %3760 = vmatprep.mubr.msk.f32.mxu1 %vm3997_vm5, %v3995_v23  ;;  %v2017_v16 = vsel %vm784_vm3, %v2014_v25, %v2016_v62  ;;  %v2362_v55 = vsel %vm1402_vm4, %v2359_v1, %v2361_v18 }
 0x2b5   : > { %v5223_v63 = vsel %vm1941_vm7, %v1927_v14, %v1955_v41  ;;  %vm2870_vm7 = vcmask 39936  }
 0x2b6   : > { %3704 = vmatmul.mubr.msk.f32.gmra.mxu0 %vm2020_vm9, %v2015_v12  ;;  %v2018_v46 = vrot.slane %v5223_v63, 2  ;;  %v2363_v40 = vrot.slane %v5223_v63, 4 }
 0x2b7   : > { %3761 = vmatmul.mubr.msk.f32.gmra.mxu1 %vm2020_vm9, %v5211_v26  ;;  %3706 = vmatprep.mubr.msk.f32.mxu0 %vm3997_vm5, %v3995_v23 }
 0x2b8   : > { %3763 = vmatprep.mubr.msk.f32.mxu1 %vm3997_vm5, %v3995_v23  ;;  %v2019_v30 = vsel %vm784_vm3, %v2016_v62, %v2018_v46  ;;  %v2364_v38 = vsel %vm1402_vm4, %v2361_v18, %v2363_v40  ;;  %v5367_v18 = vstv %s3141_s29  ;;  %vm2606_vm4 = vcmask 261120  }
 0x2ba   : > { %3707 = vmatmul.mubr.msk.f32.gmra.mxu0 %vm2020_vm9, %v2017_v16 }
 0x2bb   : > { %3764 = vmatmul.mubr.msk.f32.gmra.mxu1 %vm2020_vm9, %v5223_v63  ;;  %3709 = vmatprep.mubr.msk.f32.mxu0 %vm3997_vm5, %v3995_v23 }
 0x2bc   : > { %3825 = vmatprep.mubr.msk.f32.mxu1 %vm3997_vm5, %v3995_v23 }
 0x2be   : > { %3710 = vmatmul.mubr.msk.f32.gmra.mxu0 %vm2020_vm9, %v2019_v30 }
 0x2bf   : > { %3712 = vmatprep.mubr.msk.f32.mxu0 %vm3997_vm5, %v3995_v23 }
 0x2c2   : > { %3713 = vmatmul.mubr.msk.f32.gmra.mxu0 %vm2020_vm9, %v2018_v46 }
 0x2c3   : > { %3778 = vmatprep.mubr.msk.f32.mxu0 %vm3997_vm5, %v3995_v23 }
 0x2c6   : > { %3779 = vmatmul.mubr.msk.f32.vlgmr.msra.gmra.mxu0 %vm2020_vm9, %v2342_v34 }
 0x2c7   : > { %3781 = vmatprep.mubr.msk.f32.mxu0 %vm3997_vm5, %v3995_v23 }
 0x2ca   : > { %3782 = vmatmul.mubr.msk.f32.gmra.mxu0 %vm2020_vm9, %v2344_v53 }
 0x2cb   : > { %3784 = vmatprep.mubr.msk.f32.mxu0 %vm3997_vm5, %v3995_v23 }
 0x2ce   : > { %3785 = vmatmul.mubr.msk.f32.gmra.mxu0 %vm2020_vm9, %v2346_v54 }
 0x2cf   : > { %3787 = vmatprep.mubr.msk.f32.mxu0 %vm3997_vm5, %v3995_v23 }
 0x2d2   : > { %3788 = vmatmul.mubr.msk.f32.gmra.mxu0 %vm2020_vm9, %v2348_v42 }
 0x2d3   : > { %3790 = vmatprep.mubr.msk.f32.mxu0 %vm3997_vm5, %v3995_v23 }
 0x2d6   : > { %3791 = vmatmul.mubr.msk.f32.gmra.mxu0 %vm2020_vm9, %v2350_v17 }
 0x2d7   : > { %3793 = vmatprep.mubr.msk.f32.mxu0 %vm3997_vm5, %v3995_v23 }
 0x2da   : > { %3794 = vmatmul.mubr.msk.f32.gmra.mxu0 %vm2020_vm9, %v2352_v60 }
 0x2db   : > { %3796 = vmatprep.mubr.msk.f32.mxu0 %vm3997_vm5, %v3995_v23 }
 0x2de   : > { %3797 = vmatmul.mubr.msk.f32.gmra.mxu0 %vm2020_vm9, %v2354_v45 }
 0x2df   : > { %3799 = vmatprep.mubr.msk.f32.mxu0 %vm3997_vm5, %v3995_v23 }
 0x2e2   : > { %3800 = vmatmul.mubr.msk.f32.gmra.mxu0 %vm2020_vm9, %v2356_v51 }
 0x2e3   : > { %3802 = vmatprep.mubr.msk.f32.mxu0 %vm3997_vm5, %v3995_v23 }
 0x2e6   : > { %3803 = vmatmul.mubr.msk.f32.gmra.mxu0 %vm2020_vm9, %v2358_v57  ;;  %v5365_v57 = vld [vmem:[%s5582_s6] ss:$0 sm:$0xff] }
 0x2e7   : > { %3805 = vmatprep.mubr.msk.f32.mxu0 %vm3997_vm5, %v3995_v23 }
 0x2ea   : > { %3806 = vmatmul.mubr.msk.f32.gmra.mxu0 %vm2020_vm9, %v2360_v3 }
 0x2eb   : > { %3808 = vmatprep.mubr.msk.f32.mxu0 %vm3997_vm5, %v3995_v23 }
 0x2ee   : > { %3809 = vmatmul.mubr.msk.f32.gmra.mxu0 %vm2020_vm9, %v2362_v55 }
 0x2ef   : > { %3811 = vmatprep.mubr.msk.f32.mxu0 %vm3997_vm5, %v3995_v23 }
 0x2f2   : > { %3812 = vmatmul.mubr.msk.f32.gmra.mxu0 %vm2020_vm9, %v2364_v38 }
 0x2f3   : > { %3814 = vmatprep.mubr.msk.f32.mxu0 %vm3997_vm5, %v3995_v23 }
 0x2f6   : > { %3815 = vmatmul.mubr.msk.f32.gmra.mxu0 %vm2020_vm9, %v2363_v40 }
 0x34b   : > { %v2269_v0 = vpop.f32.mrf.mxu1 }
 0x34d   : > { %v3729_v39 = vpop.f32.mrf.mxu1 }
 0x34f   : > { %v2274_v5 = vpop.f32.mrf.mxu1 }
 0x351   : > { %v3732_v2 = vpop.f32.mrf.mxu1 }
 0x352   : > { %v2113_v6 = vpop.f32.mrf.mxu0 }
 0x353   : > { %v2279_v43 = vpop.f32.mrf.mxu1  ;;  %v2270_v51 = vadd.f32 %v2269_v0, %v2113_v6 }
 0x354   : > { %v3678_v8 = vpop.f32.mrf.mxu0 }
 0x355   : > { %v3735_v50 = vpop.f32.mrf.mxu1 }
 0x356   : > { %v2118_v58 = vpop.f32.mrf.mxu0 }
 0x357   : > { %v5324_v19 = vpop.f32.mrf.mxu1  ;;  %v2275_v40 = vadd.f32 %v2274_v5, %v2118_v58 }
 0x358   : > { %v3681_v20 = vpop.f32.mrf.mxu0 }
 0x359   : > { %v3738_v48 = vpop.f32.mrf.mxu1 }
 0x35a   : > { %v2123_v15 = vpop.f32.mrf.mxu0 }
 0x35b   : > { %v5326_v11 = vpop.f32.mrf.mxu1  ;;  %v2280_v39 = vadd.f32 %v2279_v43, %v2123_v15 }
 0x35c   : > { %v3684_v10 = vpop.f32.mrf.mxu0 }
 0x35d   : > { %v3741_v52 = vpop.f32.mrf.mxu1 }
 0x35e   : > { %v2128_v27 = vpop.f32.mrf.mxu0 }
 0x35f   : > { %v5328_v4 = vpop.f32.mrf.mxu1  ;;  %v2285_v58 = vadd.f32 %v5324_v19, %v2128_v27 }
 0x360   : > { %v3687_v9 = vpop.f32.mrf.mxu0 }
 0x361   : > { %v3744_v33 = vpop.f32.mrf.mxu1 }
 0x362   : > { %v5330_v21 = vpop.f32.mrf.mxu0 }
 0x363   : > { %v5332_v22 = vpop.f32.mrf.mxu1  ;;  %v2290_v33 = vadd.f32 %v5326_v11, %v5330_v21 }
 0x364   : > { %v3690_v7 = vpop.f32.mrf.mxu0 }
 0x365   : > { %v3747_v14 = vpop.f32.mrf.mxu1 }
 0x366   : > { %v5334_v24 = vpop.f32.mrf.mxu0 }
 0x367   : > { %v5336_v25 = vpop.f32.mrf.mxu1 }
 0x368   : > { %v3693_v26 = vpop.f32.mrf.mxu0 }
 0x369   : > { %v3750_v41 = vpop.f32.mrf.mxu1 }
 0x36a   : > { %v5338_v12 = vpop.f32.mrf.mxu0 }
 0x36b   : > { %v5340_v62 = vpop.f32.mrf.mxu1 }
 0x36c   : > { %v3696_v63 = vpop.f32.mrf.mxu0 }
 0x36d   : > { %v3753_v16 = vpop.f32.mrf.mxu1  ;;  %v2295_v63 = vadd.f32 %v5328_v4, %v5334_v24 }
 0x36e   : > { %v5342_v46 = vpop.f32.mrf.mxu0 }
 0x36f   : > { %v5344_v30 = vpop.f32.mrf.mxu1 }
 0x370   : > { %v3699_v32 = vpop.f32.mrf.mxu0 }
 0x371   : > { %v3756_v35 = vpop.f32.mrf.mxu1 }
 0x372   : > { %v5346_v37 = vpop.f32.mrf.mxu0 }
 0x373   : > { %v5348_v34 = vpop.f32.mrf.mxu1 }
 0x374   : > { %v3702_v31 = vpop.f32.mrf.mxu0 }
 0x375   : > { %v3759_v53 = vpop.f32.mrf.mxu1 }
 0x376   : > { %v5350_v29 = vpop.f32.mrf.mxu0  ;;  %v2300_v53 = vadd.f32 %v5332_v22, %v5338_v12 }
 0x377   : > { %v5352_v54 = vpop.f32.mrf.mxu1 }
 0x378   : > { %v3705_v59 = vpop.f32.mrf.mxu0 }
 0x379   : > { %v3762_v42 = vpop.f32.mrf.mxu1 }
 0x37a   : > { %v5354_v13 = vpop.f32.mrf.mxu0 }
 0x37b   : > { %v5356_v17 = vpop.f32.mrf.mxu1 }
 0x37c   : > { %v3708_v36 = vpop.f32.mrf.mxu0 }
 0x37d   : > { %v3765_v60 = vpop.f32.mrf.mxu1 }
 0x37e   : > { %v5358_v44 = vpop.f32.mrf.mxu0 }
 0x380   : > { %v3711_v49 = vpop.f32.mrf.mxu0 }
 0x381   : > { %v2305_v49 = vadd.f32 %v5336_v25, %v5342_v46 }
 0x382   : > { %v5360_v45 = vpop.f32.mrf.mxu0 }
 0x384   : > { %v3714_v47 = vpop.f32.mrf.mxu0 }
 0x386   : > { %v2457_v1 = vpop.f32.mrf.mxu0 }
 0x387   : > { %v2521_v56 = vadd.f32 %v2457_v1, %v2270_v51 }
 0x388   : > { %v3780_v3 = vpop.f32.mrf.mxu0 }
 0x389   : > { %v2541_v55 = vadd.f32 %v5365_v57, %v2521_v56  ;;  %v2310_v3 = vadd.f32 %v5340_v62, %v5346_v37 }
 0x38a   : > { %v2462_v38 = vpop.f32.mrf.mxu0 }
 0x38b   : > { %vm2555_vm3 = vcmp.ge.f32.partialorder %v2541_v55, 0.0  ;;  %v2569_v61 = vmul.f32 %v5367_v18, %v2541_v55  ;;  %v2522_v28 = vadd.f32 %v2462_v38, %v2275_v40 }
 0x38c   : > { %v3783_v0 = vpop.f32.mrf.mxu0 }
 0x38d   : > { %v2582_v2 = vsel %vm2555_vm3, %v2541_v55, %v2569_v61  ;;  %v2542_v6 = vadd.f32 %v5365_v57, %v2522_v28  ;;  %v2315_v28 = vadd.f32 %v5344_v30, %v5350_v29  ;;  %vm2883_vm3 = vcmask 35840  }
 0x38e   : > { %v2467_v8 = vpop.f32.mrf.mxu0  ;;  %3826 = vmatmul.mubr.msk.f32.vlgmr.msra.gmra.mxu1 %vm2606_vm4, %v2582_v2 }
 0x38f   : > { %v2570_v50 = vmul.f32 %v5367_v18, %v2542_v6  ;;  %v2523_v20 = vadd.f32 %v2467_v8, %v2280_v39  ;;  %3828 = vmatprep.mubr.msk.f32.mxu1 %vm3997_vm5, %v3995_v23  ;;  %vm2556_vm9 = vcmp.ge.f32.partialorder %v2542_v6, 0.0  ;;  %v2320_v8 = vadd.f32 %v5348_v34, %v5354_v13 }
 0x390   : > { %v3786_v5 = vpop.f32.mrf.mxu0 }
 0x391   : > { %v2543_v48 = vadd.f32 %v5365_v57, %v2523_v20  ;;  %v2583_v10 = vsel %vm2556_vm9, %v2542_v6, %v2570_v50 }
 0x392   : > { %v2472_v43 = vpop.f32.mrf.mxu0  ;;  %3829 = vmatmul.mubr.msk.f32.gmra.mxu1 %vm2606_vm4, %v2583_v10 }
 0x393   : > { %v2571_v15 = vmul.f32 %v5367_v18, %v2543_v48  ;;  %v2524_v52 = vadd.f32 %v2472_v43, %v2285_v58  ;;  %3831 = vmatprep.mubr.msk.f32.mxu1 %vm3997_vm5, %v3995_v23  ;;  %vm2557_vm10 = vcmp.ge.f32.partialorder %v2543_v48, 0.0 }
 0x394   : > { %v3789_v9 = vpop.f32.mrf.mxu0 }
 0x395   : > { %v2544_v7 = vadd.f32 %v5365_v57, %v2524_v52  ;;  %v2584_v19 = vsel %vm2557_vm10, %v2543_v48, %v2571_v15  ;;  %v2325_v48 = vadd.f32 %v5352_v54, %v5358_v44  ;;  %v2330_v9 = vadd.f32 %v5356_v17, %v5360_v45 }
 0x396   : > { %v2477_v27 = vpop.f32.mrf.mxu0  ;;  %3832 = vmatmul.mubr.msk.f32.gmra.mxu1 %vm2606_vm4, %v2584_v19 }
 0x397   : > { %v2572_v14 = vmul.f32 %v5367_v18, %v2544_v7  ;;  %v2525_v26 = vadd.f32 %v2477_v27, %v2290_v33  ;;  %3834 = vmatprep.mubr.msk.f32.mxu1 %vm3997_vm5, %v3995_v23  ;;  %vm2558_vm11 = vcmp.ge.f32.partialorder %v2544_v7, 0.0 }
 0x398   : > { %v3792_v41 = vpop.f32.mrf.mxu0 }
 0x399   : > { %v2545_v16 = vadd.f32 %v5365_v57, %v2525_v26  ;;  %v2585_v11 = vsel %vm2558_vm11, %v2544_v7, %v2572_v14  ;;  %v5454_v41 = vld [vmem:[%s5584_s8] ss:$0 sm:$0xff] }
 0x39a   : > { %v2482_v21 = vpop.f32.mrf.mxu0  ;;  %3835 = vmatmul.mubr.msk.f32.gmra.mxu1 %vm2606_vm4, %v2585_v11 }
 0x39b   : > { %v2573_v32 = vmul.f32 %v5367_v18, %v2545_v16  ;;  %v2526_v35 = vadd.f32 %v2482_v21, %v2295_v63  ;;  %3837 = vmatprep.mubr.msk.f32.mxu1 %vm3997_vm5, %v3995_v23  ;;  %vm2559_vm12 = vcmp.ge.f32.partialorder %v2545_v16, 0.0 }
 0x39c   : > { %v3795_v31 = vpop.f32.mrf.mxu0 }
 0x39d   : > { %v2546_v59 = vadd.f32 %v5365_v57, %v2526_v35  ;;  %v2586_v4 = vsel %vm2559_vm12, %v2545_v16, %v2573_v32 }
 0x39e   : > { %v2487_v24 = vpop.f32.mrf.mxu0  ;;  %3838 = vmatmul.mubr.msk.f32.gmra.mxu1 %vm2606_vm4, %v2586_v4 }
 0x39f   : > { %v2574_v42 = vmul.f32 %v5367_v18, %v2546_v59  ;;  %v2527_v36 = vadd.f32 %v2487_v24, %v2300_v53  ;;  %3840 = vmatprep.mubr.msk.f32.mxu1 %vm3997_vm5, %v3995_v23  ;;  %vm2560_vm13 = vcmp.ge.f32.partialorder %v2546_v59, 0.0 }
 0x3a0   : > { %v3798_v60 = vpop.f32.mrf.mxu0 }
 0x3a1   : > { %v2547_v47 = vadd.f32 %v5365_v57, %v2527_v36  ;;  %v2587_v22 = vsel %vm2560_vm13, %v2546_v59, %v2574_v42 }
 0x3a2   : > { %v2492_v12 = vpop.f32.mrf.mxu0  ;;  %3841 = vmatmul.mubr.msk.f32.gmra.mxu1 %vm2606_vm4, %v2587_v22 }
 0x3a3   : > { %v2575_v51 = vmul.f32 %v5367_v18, %v2547_v47  ;;  %v2528_v1 = vadd.f32 %v2492_v12, %v2305_v49  ;;  %3843 = vmatprep.mubr.msk.f32.mxu1 %vm3997_vm5, %v3995_v23  ;;  %vm2561_vm14 = vcmp.ge.f32.partialorder %v2547_v47, 0.0 }
 0x3a4   : > { %v3801_v56 = vpop.f32.mrf.mxu0 }
 0x3a5   : > { %v2548_v40 = vadd.f32 %v5365_v57, %v2528_v1  ;;  %v2588_v25 = vsel %vm2561_vm14, %v2547_v47, %v2575_v51 }
 0x3a6   : > { %v2497_v46 = vpop.f32.mrf.mxu0  ;;  %3844 = vmatmul.mubr.msk.f32.gmra.mxu1 %vm2606_vm4, %v2588_v25 }
 0x3a7   : > { %v2576_v55 = vmul.f32 %v5367_v18, %v2548_v40  ;;  %v2529_v38 = vadd.f32 %v2497_v46, %v2310_v3  ;;  %3846 = vmatprep.mubr.msk.f32.mxu1 %vm3997_vm5, %v3995_v23  ;;  %vm2562_vm15 = vcmp.ge.f32.partialorder %v2548_v40, 0.0 }
 0x3a8   : > { %v3804_v61 = vpop.f32.mrf.mxu0 }
 0x3a9   : > { %v2549_v0 = vadd.f32 %v5365_v57, %v2529_v38  ;;  %v2589_v62 = vsel %vm2562_vm15, %v2548_v40, %v2576_v55 }
 0x3aa   : > { %v2502_v37 = vpop.f32.mrf.mxu0  ;;  %3847 = vmatmul.mubr.msk.f32.gmra.mxu1 %vm2606_vm4, %v2589_v62 }
 0x3ab   : > { %v2577_v39 = vmul.f32 %v5367_v18, %v2549_v0  ;;  %v2530_v2 = vadd.f32 %v2502_v37, %v2315_v28  ;;  %3849 = vmatprep.mubr.msk.f32.mxu1 %vm3997_vm5, %v3995_v23  ;;  %vm2563_vm0 = vcmp.ge.f32.partialorder %v2549_v0, 0.0 }
 0x3ac   : > { %v3807_v6 = vpop.f32.mrf.mxu0 }
 0x3ad   : > { %v2550_v50 = vadd.f32 %v5365_v57, %v2530_v2  ;;  %v2590_v30 = vsel %vm2563_vm0, %v2549_v0, %v2577_v39  ;;  %v2776_v2 = vlaneseq }
 0x3ae   : > { %v2507_v29 = vpop.f32.mrf.mxu0  ;;  %3850 = vmatmul.mubr.msk.f32.gmra.mxu1 %vm2606_vm4, %v2590_v30 }
 0x3af   : > { %v2578_v20 = vmul.f32 %v5367_v18, %v2550_v50  ;;  %v2531_v5 = vadd.f32 %v2507_v29, %v2320_v8  ;;  %3852 = vmatprep.mubr.msk.f32.mxu1 %vm3997_vm5, %v3995_v23  ;;  %vm2564_vm1 = vcmp.ge.f32.partialorder %v2550_v50, 0.0 }
 0x3b0   : > { %v3810_v58 = vpop.f32.mrf.mxu0 }
 0x3b1   : > { %v2551_v10 = vadd.f32 %v5365_v57, %v2531_v5  ;;  %v2591_v34 = vsel %vm2564_vm1, %v2550_v50, %v2578_v20  ;;  %v5487_v58 = vand.u32 127, %v2776_v2 }
 0x3b2   : > { %v2512_v13 = vpop.f32.mrf.mxu0  ;;  %3853 = vmatmul.mubr.msk.f32.gmra.mxu1 %vm2606_vm4, %v2591_v34 }
 0x3b3   : > { %v2579_v43 = vmul.f32 %v5367_v18, %v2551_v10  ;;  %v2532_v15 = vadd.f32 %v2512_v13, %v2325_v48  ;;  %3855 = vmatprep.mubr.msk.f32.mxu1 %vm3997_vm5, %v3995_v23  ;;  %vm2565_vm2 = vcmp.ge.f32.partialorder %v2551_v10, 0.0 }
 0x3b4   : > { %v3813_v52 = vpop.f32.mrf.mxu0 }
 0x3b5   : > { %v2552_v33 = vadd.f32 %v5365_v57, %v2532_v15  ;;  %v2592_v54 = vsel %vm2565_vm2, %v2551_v10, %v2579_v43 }
 0x3b6   : > { %v2517_v44 = vpop.f32.mrf.mxu0  ;;  %3856 = vmatmul.mubr.msk.f32.gmra.mxu1 %vm2606_vm4, %v2592_v54 }
 0x3b7   : > { %v2580_v7 = vmul.f32 %v5367_v18, %v2552_v33  ;;  %v2533_v19 = vadd.f32 %v2517_v44, %v2330_v9  ;;  %3858 = vmatprep.mubr.msk.f32.mxu1 %vm3997_vm5, %v3995_v23  ;;  %vm2566_vm6 = vcmp.ge.f32.partialorder %v2552_v33, 0.0 }
 0x3b8   : > { %v3816_v27 = vpop.f32.mrf.mxu0 }
 0x3b9   : > { %v2553_v14 = vadd.f32 %v5365_v57, %v2533_v19  ;;  %v2593_v26 = vsel %vm2566_vm6, %v2552_v33, %v2580_v7 }
 0x3ba   : > { %3859 = vmatmul.mubr.msk.f32.gmra.mxu1 %vm2606_vm4, %v2593_v26 }
 0x3bb   : > { %v2581_v17 = vmul.f32 %v5367_v18, %v2553_v14  ;;  %3861 = vmatprep.mubr.msk.f32.mxu1 %vm3997_vm5, %v3995_v23  ;;  %vm2567_vm8 = vcmp.ge.f32.partialorder %v2553_v14, 0.0  ;;  %vm2856_vm5 = vcmp.lt.s32.totalorder %v5487_v58, 1 }
 0x3bd   : > { %v2594_v45 = vsel %vm2567_vm8, %v2553_v14, %v2581_v17 }
 0x3be   : > { %3862 = vmatmul.mubr.msk.f32.gmra.mxu1 %vm2606_vm4, %v2594_v45 }
 0x44e   : > { %v2712_v63 = vpop.f32.mrf.mxu1 }
 0x44f   : > { %v5457_v57 = vadd.f32 %v5454_v41, %v2712_v63 }
 0x450   : > { %v3827_v16 = vpop.f32.mrf.mxu1 }
 0x451   : > { %v2778_v11 = vsub.f32 0.0, %v5457_v57 }
 0x452   : > { %v2717_v18 = vpop.f32.mrf.mxu1 }
 0x453   : > { %v2791_v21 = vmul.f32 1.442695, %v2778_v11  ;;  %v5461_v23 = vadd.f32 %v5454_v41, %v2717_v18 }
 0x454   : > { %v3830_v32 = vpop.f32.mrf.mxu1 }
 0x455   : > { %3915 = vpow2.f32 %v2791_v21  ;;  %v2779_v35 = vsub.f32 0.0, %v5461_v23 }
 0x456   : > { %v2722_v31 = vpop.f32.mrf.mxu1 }
 0x457   : > { %v2793_v53 = vmul.f32 1.442695, %v2779_v35  ;;  %v5465_v59 = vadd.f32 %v5454_v41, %v2722_v31 }
 0x458   : > { %v3833_v4 = vpop.f32.mrf.mxu1 }
 0x459   : > { %3917 = vpow2.f32 %v2793_v53  ;;  %v2780_v24 = vsub.f32 0.0, %v5465_v59 }
 0x45a   : > { %v2727_v42 = vpop.f32.mrf.mxu1 }
 0x45b   : > { %v2795_v36 = vmul.f32 1.442695, %v2780_v24  ;;  %v5469_v60 = vadd.f32 %v5454_v41, %v2727_v42 }
 0x45c   : > { %v3836_v49 = vpop.f32.mrf.mxu1 }
 0x45d   : > { %3919 = vpow2.f32 %v2795_v36  ;;  %v2781_v47 = vsub.f32 0.0, %v5469_v60 }
 0x45e   : > { %v2732_v22 = vpop.f32.mrf.mxu1 }
 0x45f   : > { %v2797_v12 = vmul.f32 1.442695, %v2781_v47  ;;  %v5473_v51 = vadd.f32 %v5454_v41, %v2732_v22 }
 0x460   : > { %v3839_v1 = vpop.f32.mrf.mxu1 }
 0x461   : > { %3921 = vpow2.f32 %v2797_v12  ;;  %v2782_v56 = vsub.f32 0.0, %v5473_v51 }
 0x462   : > { %v3916_v3 = vpop.eup %3915  ;;  %v2737_v40 = vpop.f32.mrf.mxu1 }
 0x463   : > { %v2817_v25 = vadd.f32 1.0, %v3916_v3  ;;  %v2799_v46 = vmul.f32 1.442695, %v2782_v56  ;;  %v5477_v55 = vadd.f32 %v5454_v41, %v2737_v40 }
 0x464   : > { %v3842_v38 = vpop.f32.mrf.mxu1 }
 0x465   : > { %3923 = vrcp.f32 %v2817_v25  ;;  %v2783_v61 = vsub.f32 0.0, %v5477_v55 }
 0x466   : > { %v3918_v28 = vpop.eup %3917  ;;  %3925 = vpow2.f32 %v2799_v46  ;;  %v2742_v0 = vpop.f32.mrf.mxu1 }
 0x467   : > { %v2818_v62 = vadd.f32 1.0, %v3918_v28  ;;  %v2801_v37 = vmul.f32 1.442695, %v2783_v61  ;;  %v5481_v39 = vadd.f32 %v5454_v41, %v2742_v0 }
 0x468   : > { %v3845_v6 = vpop.f32.mrf.mxu1 }
 0x469   : > { %3927 = vrcp.f32 %v2818_v62  ;;  %v2784_v8 = vsub.f32 0.0, %v5481_v39 }
 0x46a   : > { %v3920_v50 = vpop.eup %3919  ;;  %3929 = vpow2.f32 %v2801_v37  ;;  %v2747_v30 = vpop.f32.mrf.mxu1 }
 0x46b   : > { %v2819_v29 = vadd.f32 1.0, %v3920_v50  ;;  %v2803_v20 = vmul.f32 1.442695, %v2784_v8  ;;  %v5485_v5 = vadd.f32 %v5454_v41, %v2747_v30 }
 0x46c   : > { %v3848_v48 = vpop.f32.mrf.mxu1 }
 0x46d   : > { %3931 = vrcp.f32 %v2819_v29  ;;  %v2785_v10 = vsub.f32 0.0, %v5485_v5 }
 0x46e   : > { %v3922_v34 = vpop.eup %3921  ;;  %3933 = vpow2.f32 %v2803_v20  ;;  %v2752_v13 = vpop.f32.mrf.mxu1 }
 0x46f   : > { %v2820_v43 = vadd.f32 1.0, %v3922_v34  ;;  %v2805_v15 = vmul.f32 1.442695, %v2785_v10  ;;  %v5492_v52 = vadd.f32 %v5454_v41, %v2752_v13 }
 0x470   : > { %v3851_v9 = vpop.f32.mrf.mxu1 }
 0x471   : > { %3935 = vrcp.f32 %v2820_v43  ;;  %v2786_v33 = vsub.f32 0.0, %v5492_v52 }
 0x472   : > { %v3924_v54 = vpop.eup %3923  ;;  %3937 = vpow2.f32 %v2805_v15  ;;  %v2757_v44 = vpop.f32.mrf.mxu1 }
 0x473   : > { %v3926_v7 = vpop.eup %3925  ;;  %v2857_v19 = vsel %vm2856_vm5, %v3924_v54, %v5457_v57  ;;  %v2807_v27 = vmul.f32 1.442695, %v2786_v33  ;;  %v5505_v14 = vadd.f32 %v5454_v41, %v2757_v44 }
 0x474   : > { %2871 = vst.msk [vmem:[%s5498_s19] sm:$0xff] %vm2870_vm7, %v2857_v19  ;;  %v2821_v26 = vadd.f32 1.0, %v3926_v7  ;;  %v3854_v17 = vpop.f32.mrf.mxu1 }
 0x475   : > { %3939 = vpow2.f32 %v2807_v27  ;;  %v2787_v45 = vsub.f32 0.0, %v5505_v14 }
 0x476   : > { %v3928_v63 = vpop.eup %3927  ;;  %3941 = vrcp.f32 %v2821_v26  ;;  %v2762_v16 = vpop.f32.mrf.mxu1 }
 0x477   : > { %v3930_v11 = vpop.eup %3929  ;;  %v2858_v57 = vsel %vm2856_vm5, %v3928_v63, %v5461_v23  ;;  %v2809_v18 = vmul.f32 1.442695, %v2787_v45  ;;  %v5514_v21 = vadd.f32 %v5454_v41, %v2762_v16 }
 0x478   : > { %2872 = vst.msk [vmem:[%s5498_s19 + $0x8] sm:$0xff] %vm2870_vm7, %v2858_v57  ;;  %v2822_v32 = vadd.f32 1.0, %v3930_v11  ;;  %v3857_v35 = vpop.f32.mrf.mxu1 }
 0x479   : > { %3943 = vpow2.f32 %v2809_v18  ;;  %v2788_v31 = vsub.f32 0.0, %v5514_v21 }
 0x47a   : > { %v3932_v53 = vpop.eup %3931  ;;  %3945 = vrcp.f32 %v2822_v32  ;;  %v2767_v4 = vpop.f32.mrf.mxu1 }
 0x47b   : > { %v3934_v24 = vpop.eup %3933  ;;  %v2859_v23 = vsel %vm2856_vm5, %v3932_v53, %v5465_v59  ;;  %v2811_v42 = vmul.f32 1.442695, %v2788_v31  ;;  %v2768_v36 = vadd.f32 %v5454_v41, %v2767_v4 }
 0x47c   : > { %2873 = vst.msk [vmem:[%s5498_s19 + $0x10] sm:$0xff] %vm2870_vm7, %v2859_v23  ;;  %v2823_v49 = vadd.f32 1.0, %v3934_v24  ;;  %v3860_v47 = vpop.f32.mrf.mxu1 }
 0x47d   : > { %3947 = vpow2.f32 %v2811_v42  ;;  %v2789_v22 = vsub.f32 0.0, %v2768_v36 }
 0x47e   : > { %v3936_v12 = vpop.eup %3935  ;;  %3949 = vrcp.f32 %v2823_v49  ;;  %v2772_v1 = vpop.f32.mrf.mxu1 }
 0x47f   : > { %v3938_v56 = vpop.eup %3937  ;;  %v2860_v3 = vsel %vm2856_vm5, %v3936_v12, %v5469_v60  ;;  %v2813_v40 = vmul.f32 1.442695, %v2789_v22  ;;  %v2773_v59 = vadd.f32 %v5454_v41, %v2772_v1 }
 0x480   : > { %2874 = vst.msk [vmem:[%s5498_s19 + $0x18] sm:$0xff] %vm2870_vm7, %v2860_v3  ;;  %v2824_v25 = vadd.f32 1.0, %v3938_v56  ;;  %v3863_v46 = vpop.f32.mrf.mxu1 }
 0x481   : > { %3951 = vpow2.f32 %v2813_v40  ;;  %v2790_v38 = vsub.f32 0.0, %v2773_v59 }
 0x482   : > { %v3940_v61 = vpop.eup %3939  ;;  %3953 = vrcp.f32 %v2824_v25 }
 0x483   : > { %v3942_v28 = vpop.eup %3941  ;;  %v2825_v0 = vadd.f32 1.0, %v3940_v61  ;;  %v2815_v62 = vmul.f32 1.442695, %v2790_v38 }
 0x484   : > { %v2861_v60 = vsel %vm2856_vm5, %v3942_v28, %v5473_v51 }
 0x485   : > { %2875 = vst.msk [vmem:[%s5498_s19 + $0x20] sm:$0xff] %vm2870_vm7, %v2861_v60  ;;  %3955 = vrcp.f32 %v2825_v0 }
 0x486   : > { %v3944_v41 = vpop.eup %3943  ;;  %3957 = vpow2.f32 %v2815_v62 }
 0x487   : > { %v3946_v37 = vpop.eup %3945  ;;  %v2826_v2 = vadd.f32 1.0, %v3944_v41 }
 0x488   : > { %v2862_v6 = vsel %vm2856_vm5, %v3946_v37, %v5477_v55 }
 0x489   : > { %2876 = vst.msk [vmem:[%s5498_s19 + $0x28] sm:$0xff] %vm2870_vm7, %v2862_v6  ;;  %3959 = vrcp.f32 %v2826_v2 }
 0x48a   : > { %v3948_v8 = vpop.eup %3947 }
 0x48b   : > { %v3950_v50 = vpop.eup %3949  ;;  %v2827_v30 = vadd.f32 1.0, %v3948_v8 }
 0x48c   : > { %v2863_v51 = vsel %vm2856_vm5, %v3950_v50, %v5481_v39 }
 0x48d   : > { %2877 = vst.msk [vmem:[%s5498_s19 + $0x30] sm:$0xff] %vm2870_vm7, %v2863_v51  ;;  %3961 = vrcp.f32 %v2827_v30 }
 0x48e   : > { %v3952_v29 = vpop.eup %3951 }
 0x48f   : > { %v3954_v20 = vpop.eup %3953  ;;  %v2828_v48 = vadd.f32 1.0, %v3952_v29 }
 0x490   : > { %v2864_v55 = vsel %vm2856_vm5, %v3954_v20, %v5485_v5 }
 0x491   : > { %2878 = vst.msk [vmem:[%s5498_s19 + $0x38] sm:$0xff] %vm2870_vm7, %v2864_v55  ;;  %3963 = vrcp.f32 %v2828_v48 }
 0x492   : > { %v3956_v10 = vpop.eup %3955 }
 0x493   : > { %v3958_v34 = vpop.eup %3957  ;;  %v2865_v39 = vsel %vm2856_vm5, %v3956_v10, %v5492_v52 }
 0x494   : > { %2879 = vst.msk [vmem:[%s5498_s19 + $0x40] sm:$0xff] %vm2870_vm7, %v2865_v39  ;;  %v2829_v13 = vadd.f32 1.0, %v3958_v34 }
 0x496   : > { %v3960_v43 = vpop.eup %3959  ;;  %3965 = vrcp.f32 %v2829_v13 }
 0x497   : > { %v2866_v5 = vsel %vm2856_vm5, %v3960_v43, %v5505_v14 }
 0x498   : > { %2880 = vst.msk [vmem:[%s5498_s19 + $0x48] sm:$0xff] %vm2870_vm7, %v2866_v5 }
 0x49a   : > { %v3962_v15 = vpop.eup %3961 }
 0x49b   : > { %v2867_v9 = vsel %vm2856_vm5, %v3962_v15, %v5514_v21 }
 0x49c   : > { %2881 = vst.msk [vmem:[%s5498_s19 + $0x50] sm:$0xff] %vm2870_vm7, %v2867_v9 }
 0x49e   : > { %v3964_v52 = vpop.eup %3963 }
 0x49f   : > { %v2868_v33 = vsel %vm2856_vm5, %v3964_v52, %v2768_v36 }
 0x4a0   : > { %2882 = vst.msk [vmem:[%s5498_s19 + $0x58] sm:$0xff] %vm2870_vm7, %v2868_v33 }
 0x4a3   : > { %v3966_v54 = vpop.eup %3965 }
 0x4a4   : > { %v2869_v44 = vsel %vm2856_vm5, %v3966_v54, %v2773_v59 }
 0x4a5   : > { %2884 = vst.msk [vmem:[%s5498_s19 + $0x60] sm:$0xf] %vm2883_vm3, %v2869_v44 }
 0x4a6 PF: > { %s21_s13 = sadd.s32 1, %s3992_s13  }
 0x4a7   : > { %p18_p1 = scmp.ge.s32.totalorder %s21_s13, 4  }
 0x4a9   :  { %20 = sbr.rel (!%p18_p1) target bundleno = 1 (0x1), region = 101 }
 0x4ae   :  { %2906 = vsyncpa [#allocation3], 1 }
 0x4af   :  { %2908 = vsyncpa [#allocation3 + $0x1], 1 }

</bundles_post_ra>
